<compile_context>
chip_gen: v6e
topology: v6e:2x2x1
jax: 0.10.0
libtpu: 0.0.40
codegen_flags: <defaults>
</compile_context>

<pallas_src>
import jax
import jax.numpy as jnp
from jax.experimental import pallas as pl
from jax.experimental.pallas import tpu as pltpu


def _round_up(x, m):
    return ((x + m - 1) // m) * m


def _pick_spatial_tile(total):
    # `total` is a multiple of 128; pick the largest convenient tile that divides it.
    for c in (1024, 512, 256, 128):
        if total % c == 0:
            return min(c, total)
    return total


# ----------------------------------------------------------------------------
# Pallas kernel: one (Cout_pad, Cin) x (Cin, tn) bf16 matmul + fused f32 bias.
# ----------------------------------------------------------------------------
def _conv1x1_kernel(w_ref, x_ref, bias_ref, o_ref):
    # w_ref:    (Cout_pad, Cin)  bf16  (constant across the grid)
    # x_ref:    (Cin, tn)        bf16  (one batch element, one spatial tile)
    # bias_ref: (Cout_pad, 1)    f32
    # o_ref:    (Cout_pad, tn)   f32
    o_ref[...] = (
        jnp.dot(w_ref[...], x_ref[...], preferred_element_type=jnp.float32)
        + bias_ref[...]
    )


def conv1x1_nchw(x, w_packed, bias_packed, n_classes):
    """x: (N, Cin, H, W) f32, w_packed: (Cout_pad, Cin) bf16, bias_packed: (Cout_pad, 1) f32
    -> (N, n_classes, H, W) f32."""
    N, Cin, H, W = x.shape
    Cout_pad, Cin_w = w_packed.shape
    assert Cin == Cin_w, (Cin, Cin_w)
    HW = H * W

    # bf16 cast first (halves HBM bytes), then a free contiguous reshape.
    x3 = x.astype(jnp.bfloat16).reshape(N, Cin, HW)
    HWp = _round_up(HW, 128)
    if HWp != HW:                       # pad the lane dim only when needed
        x3 = jnp.pad(x3, ((0, 0), (0, 0), (0, HWp - HW)))

    tn = _pick_spatial_tile(HWp)
    grid = (N, HWp // tn)

    out = pl.pallas_call(
        _conv1x1_kernel,
        out_shape=jax.ShapeDtypeStruct((N, Cout_pad, HWp), jnp.float32),
        grid_spec=pltpu.PrefetchScalarGridSpec(
            num_scalar_prefetch=0,
            grid=grid,
            in_specs=[
                pl.BlockSpec((Cout_pad, Cin), lambda n, j: (0, 0)),     # weight (resident)
                pl.BlockSpec((None, Cin, tn), lambda n, j: (n, 0, j)),  # x, batch squeezed
                pl.BlockSpec((Cout_pad, 1), lambda n, j: (0, 0)),       # bias
            ],
            out_specs=pl.BlockSpec((None, Cout_pad, tn), lambda n, j: (n, 0, j)),
        ),
        compiler_params=pltpu.CompilerParams(
            dimension_semantics=("parallel", "parallel")),
    )(w_packed, x3, bias_packed)

    return out[:, :n_classes, :HW].reshape(N, n_classes, H, W)


# ----------------------------------------------------------------------------
# alexnet_segmenter: classifier = Conv2d(4096, n_classes, kernel_size=1)
# ----------------------------------------------------------------------------
def make_params(n_classes=21, in_channels=4096, seed=0):
    key = jax.random.PRNGKey(seed)
    wk, bk = jax.random.split(key)
    w = jax.random.normal(wk, (n_classes, in_channels, 1, 1), jnp.float32) * jnp.sqrt(
        2.0 / in_channels)
    b = jax.random.normal(bk, (n_classes,), jnp.float32) * 0.01
    return {"classifier": (w, b)}


def prepare_params(params):
    """One-time weight prep hoisted out of the forward path:
    reshape (Cout,Cin,1,1)->(Cout,Cin), pad Cout to a multiple of 32, bf16 cast."""
    w, b = params["classifier"]
    cout, cin = int(w.shape[0]), int(w.shape[1])
    cout_pad = max(_round_up(cout, 32), 32)      # 16-row bf16 sublane packing, 8-row f32 out
    w2 = w.reshape(cout, cin).astype(jnp.bfloat16)
    w_packed = jnp.pad(w2, ((0, cout_pad - cout), (0, 0)))
    bias_packed = jnp.pad(b.astype(jnp.float32), (0, cout_pad - cout)).reshape(cout_pad, 1)
    return {"w_packed": w_packed, "bias_packed": bias_packed, "n_classes": cout}


def alexnet_segmenter_forward(prepared, x):
    # learned_billinear=False path: forward is just the 1x1-conv classifier.
    return conv1x1_nchw(x, prepared["w_packed"], prepared["bias_packed"],
                        prepared["n_classes"])


# ----------------------------------------------------------------------------
if __name__ == "__main__":
    n_classes = 21
    batch, in_ch, H, W = 2, 4096, 8, 8          # Cin=4096 is fixed by the module

    key = jax.random.PRNGKey(0)
    x = jax.random.normal(key, (batch, in_ch, H, W), jnp.float32)

    params = make_params(n_classes=n_classes, seed=0)
    prepared = prepare_params(params)

    fwd = jax.jit(lambda xx, wp, bp: conv1x1_nchw(xx, wp, bp, n_classes))
    out = fwd(x, prepared["w_packed"], prepared["bias_packed"])
    out = jax.block_until_ready(out)

    assert out.shape == (batch, n_classes, H, W), out.shape
    assert out.dtype == jnp.float32
    assert bool(jnp.all(jnp.isfinite(out)))

    # Reference check (f32 einsum); loose tolerance because operands go through bf16.
    w, b = params["classifier"]
    ref = jnp.einsum("nchw,oc->nohw", x, w.reshape(n_classes, in_ch)) + b[None, :, None, None]
    max_err = float(jnp.max(jnp.abs(out - ref)))
    assert max_err < 5e-2, max_err

    print("KERNEL_OK")
</pallas_src>

<mosaic_0001>
module attributes {stable_mosaic.version = 11 : i64} {
  func.func @_conv1x1_kernel(%arg0: i32, %arg1: i32, %arg2: memref<32x4096xbf16, #tpu.memory_space<vmem>>, %arg3: memref<1x4096x128xbf16, #tpu.memory_space<vmem>>, %arg4: memref<32x1xf32, #tpu.memory_space<vmem>>, %arg5: memref<1x32x128xf32, #tpu.memory_space<vmem>>) attributes {dimension_semantics = [#tpu.dimension_semantics<parallel>, #tpu.dimension_semantics<parallel>], iteration_bounds = array<i64: 2, 1>, scalar_prefetch = 0 : i64, scratch_operands = 0 : i64, tpu.core_type = #tpu.core_type<tc>, window_params = [{pipeline_mode = #tpu.pipeline_mode<synchronous>, transform_indices = @transform_0, window_bounds = array<i64: 32, 4096>}, {transform_indices = @transform_1, window_bounds = array<i64: 1, 4096, 128>}, {pipeline_mode = #tpu.pipeline_mode<synchronous>, transform_indices = @transform_2, window_bounds = array<i64: 32, 1>}, {transform_indices = @transform_3, window_bounds = array<i64: 1, 32, 128>}]} {
    %c0 = arith.constant 0 : index
    %c0_0 = arith.constant 0 : index
    %0 = vector.load %arg2[%c0, %c0_0] : memref<32x4096xbf16, #tpu.memory_space<vmem>>, vector<32x4096xbf16>
    %c0_1 = arith.constant 0 : index
    %c0_2 = arith.constant 0 : index
    %c0_3 = arith.constant 0 : index
    %1 = vector.load %arg3[%c0_1, %c0_2, %c0_3] : memref<1x4096x128xbf16, #tpu.memory_space<vmem>>, vector<1x4096x128xbf16>
    %2 = vector.shape_cast %1 : vector<1x4096x128xbf16> to vector<4096x128xbf16>
    %cst = arith.constant dense<0.000000e+00> : vector<32x128xf32>
    %3 = tpu.matmul %0, %2, %cst {dimension_numbers = #tpu.dot_dimension_numbers<[1], [0], [0], [1], [0, 0, 1, 1], [], []>} : vector<32x4096xbf16>, vector<4096x128xbf16>, vector<32x128xf32> -> vector<32x128xf32>
    %c0_4 = arith.constant 0 : index
    %c0_5 = arith.constant 0 : index
    %4 = vector.load %arg4[%c0_4, %c0_5] : memref<32x1xf32, #tpu.memory_space<vmem>>, vector<32x1xf32>
    %5 = vector.broadcast %4 : vector<32x1xf32> to vector<32x128xf32>
    %6 = arith.addf %3, %5 : vector<32x128xf32>
    %c0_6 = arith.constant 0 : index
    %c0_7 = arith.constant 0 : index
    %c0_8 = arith.constant 0 : index
    %7 = vector.load %arg5[%c0_6, %c0_7, %c0_8] : memref<1x32x128xf32, #tpu.memory_space<vmem>>, vector<1x32x128xf32>
    %8 = vector.shape_cast %7 : vector<1x32x128xf32> to vector<32x128xf32>
    %9 = vector.shape_cast %6 : vector<32x128xf32> to vector<1x32x128xf32>
    tpu.vector_store %arg5[%c0_6, %c0_7, %c0_8], %9 {strides = array<i32>} : memref<1x32x128xf32, #tpu.memory_space<vmem>>, vector<1x32x128xf32>,
    return
  }
  func.func @transform_0(%arg0: i32, %arg1: i32) -> (i32, i32) {
    %c0_i32 = arith.constant 0 : i32
    %c0_i32_0 = arith.constant 0 : i32
    %c0_i32_1 = arith.constant 0 : i32
    return %c0_i32, %c0_i32_0 : i32, i32
  }
  func.func @transform_1(%arg0: i32, %arg1: i32) -> (i32, i32, i32) {
    %c0_i32 = arith.constant 0 : i32
    %c0_i32_0 = arith.constant 0 : i32
    return %arg0, %c0_i32, %arg1 : i32, i32, i32
  }
  func.func @transform_2(%arg0: i32, %arg1: i32) -> (i32, i32) {
    %c0_i32 = arith.constant 0 : i32
    %c0_i32_0 = arith.constant 0 : i32
    %c0_i32_1 = arith.constant 0 : i32
    return %c0_i32, %c0_i32_0 : i32, i32
  }
  func.func @transform_3(%arg0: i32, %arg1: i32) -> (i32, i32, i32) {
    %c0_i32 = arith.constant 0 : i32
    %c0_i32_0 = arith.constant 0 : i32
    return %arg0, %c0_i32, %arg1 : i32, i32, i32
  }
}

</mosaic_0001>

<bundles_post_ra>
// kernel: _lambda_.1
= control target key start
LH: loop header
LB: loop body
LE: loop exit
PB: predicated region body
PF: predicated region fallthrough
CT: control target
= control target key end

     0   :  { %s4639_s12 = smov 0   ;;  %s4641_s13 = smov 0   ;;  %s5379_s0 = inlined_call_operand.vmem [shape: bf16[32,4096], index: 0, kind: input, shape index: {}]   ;;  %s5380_s1 = inlined_call_operand.vmem [shape: bf16[2,4096,128], index: 1, kind: input, shape index: {}]   ;;  %s5381_s2 = inlined_call_operand.vmem [shape: f32[32,1], index: 2, kind: input, shape index: {}]   ;;  %s5382_s3 = inlined_call_operand.vmem [shape: f32[2,32,128], index: 3, kind: output, shape index: {}]  }
   0x1   :  { %s4643_s14 = smov 0  }
   0x2 LB: > { %s25_s15 = sadd.s32 1, %s4612_s13  ;;  %p3534_p0 = scmp.ge.s32.totalorder %s4616_s14, 1  ;;  %s4616_s14 = sphi %s4643_s14, %s13_s14   ;;  %s4612_s13 = sphi %s4641_s13, %s5416_s13   ;;  %s4608_s12 = sphi %s4639_s12, %s5415_s12  }
   0x3   : > { %p27_p1 = scmp.ge.s32.totalorder %s25_s15, 2  ;;  %p156_p2 = scmp.lt.s32.totalorder %s4616_s14, 3 }
   0x5   : > { %s5418_s15 = smov (%p27_p1, %s25_s15), 0  ;;  %p157_p3 = pnand %p3534_p0, %p156_p2 }
   0x7   : > { %160 = sbr.rel (%p157_p3) target bundleno = 489 (0x1e9), region = 32 }
   0xc   : > { %p186_p4 = scmp.lt.s32.totalorder %s4608_s12, 1  ;;  %v4660_v0 = vld [vmem:[%s5379_s0] sm:$0xff]  ;;  %v4670_v2 = vld [vmem:[%s5379_s0 + $0x8] sm:$0xff]  ;;  %v4618_v5 = vmov 0   ;;  %v4745_v52 = vld [vmem:[%s5379_s0 + $0x10] sm:$0xff] }
   0xd   : > { %v4665_v1 = vld [vmem:[%s5379_s0 + $0x80] sm:$0xff]  ;;  %v4677_v4 = vld [vmem:[%s5379_s0 + $0x88] sm:$0xff]  ;;  %4336 = vset.pattern.permute.xlu0 %v4618_v5  ;;  %4337 = vset.pattern.permute.xlu1 %v4618_v5  ;;  %v4750_v53 = vld [vmem:[%s5379_s0 + $0x90] sm:$0xff] }
   0xe   : > { %v3540_v3 = vcombine.high %v4660_v0, %v4665_v1  ;;  %s5420_s12 = smov (!%p186_p4, %s4608_s12), 1  ;;  %v3542_v6 = vcombine.high %v4670_v2, %v4677_v4  ;;  %v235_v36 = vld [vmem:[%s5379_s0 + $0x100] sm:$0xff]  ;;  %v236_v39 = vld [vmem:[%s5379_s0 + $0x108] sm:$0xff]  ;;  %v3539_v43 = vcombine.low %v4660_v0, %v4665_v1  ;;  %v3541_v44 = vcombine.low %v4670_v2, %v4677_v4  ;;  %v4756_v55 = vld [vmem:[%s5379_s0 + $0x18] sm:$0xff] }
   0xf   : > { %s3861_s24 = sshll.u32 %s5420_s12, 11  ;;  %v251_v37 = vld [vmem:[%s5379_s0 + $0x180] sm:$0xff]  ;;  %v252_v40 = vld [vmem:[%s5379_s0 + $0x188] sm:$0xff]  ;;  %v4761_v56 = vld [vmem:[%s5379_s0 + $0x98] sm:$0xff]  ;;  %v3544_v63 = vcombine.high %v4745_v52, %v4750_v53  ;;  %s3862_s22 = sshll.u32 %s5420_s12, 5 }
  0x10   : > { %2691 = vmatprep.mubr.bf16.mxu0 %v3540_v3  ;;  %2740 = vmatprep.mubr.bf16.mxu1 %v3542_v6  ;;  %s4687_s27 = scalar_lea.vmem %s5380_s1, %s3861_s24  ;;  %v3572_v47 = vcombine.high %v235_v36, %v251_v37  ;;  %v3574_v49 = vcombine.high %v236_v39, %v252_v40  ;;  %v3571_v59 = vcombine.low %v235_v36, %v251_v37  ;;  %v4817_v36 = vld [vmem:[%s5379_s0 + $0x20] sm:$0xff]  ;;  %s5364_s25 = scalar_lea.vmem %s5382_s3, %s3862_s22 }
  0x11   : > { %v4338_v7 = vld [vmem:[%s4687_s27 + $0x78] sm:$0xff]   ;;  %v4342_v11 = vld [vmem:[%s4687_s27 + $0x70] sm:$0xff]   ;;  %v4346_v15 = vld [vmem:[%s4687_s27 + $0x68] sm:$0xff]   ;;  %v3573_v61 = vcombine.low %v236_v39, %v252_v40  ;;  %v3546_v1 = vcombine.high %v4756_v55, %v4761_v56 }
  0x12   : > { %v4339_v8 = vld [vmem:[%s4687_s27 + $0xf8] sm:$0xff]   ;;  %3863 = vmatprep.subr.bf16.mxu0 %v4338_v7  ;;  %v4343_v12 = vld [vmem:[%s4687_s27 + $0xf0] sm:$0xff]   ;;  %v4347_v16 = vld [vmem:[%s4687_s27 + $0xe8] sm:$0xff]  }
  0x13   : > { %v4340_v9 = vld [vmem:[%s4687_s27 + $0x38] sm:$0xff]   ;;  %3891 = vmatprep.subr.bf16.mxu1 %v4339_v8  ;;  %v4344_v13 = vld [vmem:[%s4687_s27 + $0x30] sm:$0xff]   ;;  %v4348_v17 = vld [vmem:[%s4687_s27 + $0x28] sm:$0xff]  }
  0x14   : > { %v4341_v10 = vld [vmem:[%s4687_s27 + $0xb8] sm:$0xff]   ;;  %3864 = vmatpush3.bf16.msra.mxu0 %v4340_v9  ;;  %v4345_v14 = vld [vmem:[%s4687_s27 + $0xb0] sm:$0xff]   ;;  %v4349_v18 = vld [vmem:[%s4687_s27 + $0xa8] sm:$0xff]  }
  0x15   : > { %3892 = vmatpush3.bf16.msra.mxu1 %v4341_v10  ;;  %3865 = vmatprep.subr.bf16.mxu0 %v4342_v11  ;;  %v4350_v19 = vld [vmem:[%s4687_s27 + $0x60] sm:$0xff]   ;;  %v4354_v23 = vld [vmem:[%s4687_s27 + $0x58] sm:$0xff]   ;;  %v4358_v27 = vld [vmem:[%s4687_s27 + $0x50] sm:$0xff]  }
  0x16   : > { %3893 = vmatprep.subr.bf16.mxu1 %v4343_v12  ;;  %v4351_v20 = vld [vmem:[%s4687_s27 + $0xe0] sm:$0xff]   ;;  %v4355_v24 = vld [vmem:[%s4687_s27 + $0xd8] sm:$0xff]   ;;  %v4359_v28 = vld [vmem:[%s4687_s27 + $0xd0] sm:$0xff]  }
  0x17   : > { %v4352_v21 = vld [vmem:[%s4687_s27 + $0x20] sm:$0xff]   ;;  %v4356_v25 = vld [vmem:[%s4687_s27 + $0x18] sm:$0xff]   ;;  %v4360_v29 = vld [vmem:[%s4687_s27 + $0x10] sm:$0xff]  }
  0x18   : > { %3866 = vmatpush3.bf16.msra.mxu0 %v4344_v13  ;;  %v4353_v22 = vld [vmem:[%s4687_s27 + $0xa0] sm:$0xff]   ;;  %v4357_v26 = vld [vmem:[%s4687_s27 + $0x98] sm:$0xff]   ;;  %v4361_v30 = vld [vmem:[%s4687_s27 + $0x90] sm:$0xff]  }
  0x19   : > { %3894 = vmatpush3.bf16.msra.mxu1 %v4345_v14  ;;  %3867 = vmatprep.subr.bf16.mxu0 %v4346_v15  ;;  %v4362_v31 = vld [vmem:[%s4687_s27 + $0x48] sm:$0xff]   ;;  %v4366_v35 = vld [vmem:[%s4687_s27 + $0x40] sm:$0xff]   ;;  %v4370_v45 = vld [vmem:[%s4687_s27 + $0x178] sm:$0xff]  }
  0x1a   : > { %3895 = vmatprep.subr.bf16.mxu1 %v4347_v16  ;;  %v4363_v32 = vld [vmem:[%s4687_s27 + $0xc8] sm:$0xff]   ;;  %v4367_v38 = vld [vmem:[%s4687_s27 + $0xc0] sm:$0xff]   ;;  %v4371_v46 = vld [vmem:[%s4687_s27 + $0x1f8] sm:$0xff]  }
  0x1b   : > { %v4364_v33 = vld [vmem:[%s4687_s27 + $0x8] sm:$0xff]   ;;  %v4368_v41 = vld [vmem:[%s4687_s27] sm:$0xff]   ;;  %v4372_v48 = vld [vmem:[%s4687_s27 + $0x138] sm:$0xff]  }
  0x1c   : > { %3868 = vmatpush3.bf16.msra.mxu0 %v4348_v17  ;;  %v4365_v34 = vld [vmem:[%s4687_s27 + $0x88] sm:$0xff]   ;;  %v4369_v42 = vld [vmem:[%s4687_s27 + $0x80] sm:$0xff]   ;;  %v4373_v50 = vld [vmem:[%s4687_s27 + $0x1b8] sm:$0xff]  }
  0x1d   : > { %3896 = vmatpush3.bf16.msra.mxu1 %v4349_v18  ;;  %3869 = vmatprep.subr.bf16.mxu0 %v4350_v19  ;;  %v4374_v51 = vld [vmem:[%s4687_s27 + $0x170] sm:$0xff]   ;;  %v4378_v60 = vld [vmem:[%s4687_s27 + $0x168] sm:$0xff]   ;;  %v4382_v3 = vld [vmem:[%s4687_s27 + $0x160] sm:$0xff]  }
  0x1e   : > { %3897 = vmatprep.subr.bf16.mxu1 %v4351_v20  ;;  %v4375_v54 = vld [vmem:[%s4687_s27 + $0x1f0] sm:$0xff]   ;;  %v4379_v62 = vld [vmem:[%s4687_s27 + $0x1e8] sm:$0xff]   ;;  %v4383_v4 = vld [vmem:[%s4687_s27 + $0x1e0] sm:$0xff]  }
  0x1f   : > { %v4376_v57 = vld [vmem:[%s4687_s27 + $0x130] sm:$0xff]   ;;  %v4380_v0 = vld [vmem:[%s4687_s27 + $0x128] sm:$0xff]   ;;  %v4384_v5 = vld [vmem:[%s4687_s27 + $0x120] sm:$0xff]  }
  0x20   : > { %3870 = vmatpush3.bf16.msra.mxu0 %v4352_v21  ;;  %v4377_v58 = vld [vmem:[%s4687_s27 + $0x1b0] sm:$0xff]   ;;  %v4381_v2 = vld [vmem:[%s4687_s27 + $0x1a8] sm:$0xff]   ;;  %v4385_v6 = vld [vmem:[%s4687_s27 + $0x1a0] sm:$0xff]  }
  0x21   : > { %3898 = vmatpush3.bf16.msra.mxu1 %v4353_v22  ;;  %3871 = vmatprep.subr.bf16.mxu0 %v4354_v23  ;;  %v4386_v7 = vld [vmem:[%s4687_s27 + $0x158] sm:$0xff]   ;;  %v4390_v11 = vld [vmem:[%s4687_s27 + $0x150] sm:$0xff]   ;;  %v4394_v15 = vld [vmem:[%s4687_s27 + $0x148] sm:$0xff]  }
  0x22   : > { %3899 = vmatprep.subr.bf16.mxu1 %v4355_v24  ;;  %v4387_v8 = vld [vmem:[%s4687_s27 + $0x1d8] sm:$0xff]   ;;  %v4391_v12 = vld [vmem:[%s4687_s27 + $0x1d0] sm:$0xff]   ;;  %v4395_v16 = vld [vmem:[%s4687_s27 + $0x1c8] sm:$0xff]  }
  0x23   : > { %v4388_v9 = vld [vmem:[%s4687_s27 + $0x118] sm:$0xff]   ;;  %v4392_v13 = vld [vmem:[%s4687_s27 + $0x110] sm:$0xff]   ;;  %v4396_v17 = vld [vmem:[%s4687_s27 + $0x108] sm:$0xff]  }
  0x24   : > { %3872 = vmatpush3.bf16.msra.mxu0 %v4356_v25  ;;  %v4389_v10 = vld [vmem:[%s4687_s27 + $0x198] sm:$0xff]   ;;  %v4393_v14 = vld [vmem:[%s4687_s27 + $0x190] sm:$0xff]   ;;  %v4397_v18 = vld [vmem:[%s4687_s27 + $0x188] sm:$0xff]  }
  0x25   : > { %3900 = vmatpush3.bf16.msra.mxu1 %v4357_v26  ;;  %3873 = vmatprep.subr.bf16.mxu0 %v4358_v27  ;;  %v4398_v19 = vld [vmem:[%s4687_s27 + $0x140] sm:$0xff]   ;;  %v237_v20 = vld [vmem:[%s5379_s0 + $0x110] sm:$0xff]  ;;  %v238_v23 = vld [vmem:[%s5379_s0 + $0x118] sm:$0xff]  ;;  %v3543_v27 = vcombine.low %v4745_v52, %v4750_v53 }
  0x26   : > { %3901 = vmatprep.subr.bf16.mxu1 %v4359_v28  ;;  %v253_v21 = vld [vmem:[%s5379_s0 + $0x190] sm:$0xff]  ;;  %v4399_v22 = vld [vmem:[%s4687_s27 + $0x1c0] sm:$0xff]   ;;  %v254_v24 = vld [vmem:[%s5379_s0 + $0x198] sm:$0xff]  ;;  %v3545_v28 = vcombine.low %v4756_v55, %v4761_v56 }
  0x27   : > { %v4400_v25 = vld [vmem:[%s4687_s27 + $0x100] sm:$0xff]   ;;  %v4408_v39 = vld [vmem:[%s4687_s27 + $0x230] sm:$0xff]   ;;  %v4418_v52 = vld [vmem:[%s4687_s27 + $0x258] sm:$0xff]  }
  0x28   : > { %3874 = vmatpush3.bf16.msra.mxu0 %v4360_v29  ;;  %v4401_v26 = vld [vmem:[%s4687_s27 + $0x180] sm:$0xff]   ;;  %v4402_v29 = vld [vmem:[%s4687_s27 + $0x278] sm:$0xff]   ;;  %v4409_v40 = vld [vmem:[%s4687_s27 + $0x2b0] sm:$0xff]  }
  0x29   : > { %3902 = vmatpush3.bf16.msra.mxu1 %v4361_v30  ;;  %3875 = vmatprep.subr.bf16.mxu0 %v4362_v31  ;;  %v4403_v30 = vld [vmem:[%s4687_s27 + $0x2f8] sm:$0xff]   ;;  %v3576_v31 = vcombine.high %v237_v20, %v253_v21  ;;  %v4822_v37 = vld [vmem:[%s5379_s0 + $0xa0] sm:$0xff]  ;;  %v4422_v56 = vld [vmem:[%s4687_s27 + $0x250] sm:$0xff]  }
  0x2a   : > { %3903 = vmatprep.subr.bf16.mxu1 %v4363_v32  ;;  %v4404_v32 = vld [vmem:[%s4687_s27 + $0x238] sm:$0xff]  }
  0x2b   : > { %v4419_v53 = vld [vmem:[%s4687_s27 + $0x2d8] sm:$0xff]  }
  0x2c   : > { %3876 = vmatpush3.bf16.msra.mxu0 %v4364_v33  ;;  %v3578_v33 = vcombine.high %v238_v23, %v254_v24  ;;  %v4421_v55 = vld [vmem:[%s4687_s27 + $0x298] sm:$0xff]  }
  0x2d   : > { %3904 = vmatpush3.bf16.msra.mxu1 %v4365_v34  ;;  %3877 = vmatprep.subr.bf16.mxu0 %v4366_v35  ;;  %v4405_v34 = vld [vmem:[%s4687_s27 + $0x2b8] sm:$0xff]   ;;  %v4406_v35 = vld [vmem:[%s4687_s27 + $0x270] sm:$0xff]  }
  0x2e   : > { %3905 = vmatprep.subr.bf16.mxu1 %v4367_v38  ;;  %v4407_v38 = vld [vmem:[%s4687_s27 + $0x2f0] sm:$0xff]  }
  0x30   : > { %3878 = vmatpush3.bf16.msra.mxu0 %v4368_v41  ;;  %v3575_v41 = vcombine.low %v237_v20, %v253_v21  ;;  %v4442_v21 = vld [vmem:[%s4687_s27 + $0x368] sm:$0xff]  }
  0x31   : > { %3906 = vmatpush3.bf16.msra.mxu1 %v4369_v42  ;;  %3919 = vmatprep.subr.bf16.mxu0 %v4370_v45  ;;  %v4410_v42 = vld [vmem:[%s4687_s27 + $0x268] sm:$0xff]   ;;  %v3548_v45 = vcombine.high %v4817_v36, %v4822_v37 }
  0x32   : > { %3947 = vmatprep.subr.bf16.mxu1 %v4371_v46  ;;  %v4412_v46 = vld [vmem:[%s4687_s27 + $0x228] sm:$0xff]  }
  0x33   : > { %2692 = vmatmul.mubr.bf16.vlgmr.msra.gmra.mxu0 %v3539_v43  ;;  %v3577_v43 = vcombine.low %v238_v23, %v254_v24  ;;  %v779_v23 = vld [vmem:[%s5381_s2] sm:$0xff]  ;;  %v240_v24 = vld [vmem:[%s5379_s0 + $0x128] sm:$0xff] }
  0x34   : > { %2741 = vmatmul.mubr.bf16.vlgmr.msra.gmra.mxu1 %v3541_v44  ;;  %3920 = vmatpush3.bf16.msra.mxu0 %v4372_v48  ;;  %v4411_v44 = vld [vmem:[%s4687_s27 + $0x2e8] sm:$0xff]   ;;  %v4414_v48 = vld [vmem:[%s4687_s27 + $0x260] sm:$0xff]  }
  0x35   : > { %3948 = vmatpush3.bf16.msra.mxu1 %v4373_v50  ;;  %2699 = vmatprep.mubr.bf16.mxu0 %v3572_v47  ;;  %v4413_v47 = vld [vmem:[%s4687_s27 + $0x2a8] sm:$0xff]   ;;  %v4416_v50 = vld [vmem:[%s4687_s27 + $0x220] sm:$0xff]  }
  0x36   : > { %3921 = vmatprep.subr.bf16.mxu0 %v4374_v51  ;;  %2748 = vmatprep.mubr.bf16.mxu1 %v3574_v49  ;;  %v4415_v49 = vld [vmem:[%s4687_s27 + $0x2e0] sm:$0xff]  }
  0x37   : > { %3949 = vmatprep.subr.bf16.mxu1 %v4375_v54  ;;  %v4417_v51 = vld [vmem:[%s4687_s27 + $0x2a0] sm:$0xff]   ;;  %v4420_v54 = vld [vmem:[%s4687_s27 + $0x218] sm:$0xff]   ;;  %785 = vperm.xlu0 %4336, %v779_v23  }
  0x38   : > { %3922 = vmatpush3.bf16.msra.mxu0 %v4376_v57  ;;  %v4423_v57 = vld [vmem:[%s4687_s27 + $0x2d0] sm:$0xff]   ;;  %v4484_v23 = vld [vmem:[%s4687_s27 + $0x418] sm:$0xff]  }
  0x39   : > { %3950 = vmatpush3.bf16.msra.mxu1 %v4377_v58  ;;  %3923 = vmatprep.subr.bf16.mxu0 %v4378_v60  ;;  %v4424_v58 = vld [vmem:[%s4687_s27 + $0x210] sm:$0xff]   ;;  %v4426_v60 = vld [vmem:[%s4687_s27 + $0x248] sm:$0xff]  }
  0x3a   : > { %3951 = vmatprep.subr.bf16.mxu1 %v4379_v62  ;;  %v4428_v62 = vld [vmem:[%s4687_s27 + $0x208] sm:$0xff]  }
  0x3b   : > { %2700 = vmatmul.mubr.bf16.gmra.mxu0 %v3571_v59  ;;  %v4425_v59 = vld [vmem:[%s4687_s27 + $0x290] sm:$0xff]  }
  0x3c   : > { %3924 = vmatpush3.bf16.msra.mxu0 %v4380_v0  ;;  %2749 = vmatmul.mubr.bf16.gmra.mxu1 %v3573_v61  ;;  %v4427_v61 = vld [vmem:[%s4687_s27 + $0x2c8] sm:$0xff]   ;;  %v4430_v0 = vld [vmem:[%s4687_s27 + $0x240] sm:$0xff]  }
  0x3d   : > { %3952 = vmatpush3.bf16.msra.mxu1 %v4381_v2  ;;  %2789 = vmatprep.mubr.bf16.mxu0 %v3544_v63  ;;  %v4429_v63 = vld [vmem:[%s4687_s27 + $0x288] sm:$0xff]   ;;  %v4432_v2 = vld [vmem:[%s4687_s27 + $0x200] sm:$0xff]  }
  0x3e   : > { %3925 = vmatprep.subr.bf16.mxu0 %v4382_v3  ;;  %2838 = vmatprep.mubr.bf16.mxu1 %v3546_v1  ;;  %v4431_v1 = vld [vmem:[%s4687_s27 + $0x2c0] sm:$0xff]  }
  0x3f   : > { %3953 = vmatprep.subr.bf16.mxu1 %v4383_v4  ;;  %v4433_v3 = vld [vmem:[%s4687_s27 + $0x280] sm:$0xff]   ;;  %v3547_v4 = vcombine.low %v4817_v36, %v4822_v37  ;;  %v4451_v36 = vld [vmem:[%s4687_s27 + $0x3d8] sm:$0xff]  }
  0x40   : > { %3926 = vmatpush3.bf16.msra.mxu0 %v4384_v5  ;;  %v208_v5 = vld [vmem:[%s5379_s0 + $0x28] sm:$0xff]  ;;  %v4452_v37 = vld [vmem:[%s4687_s27 + $0x318] sm:$0xff]  }
  0x41   : > { %3954 = vmatpush3.bf16.msra.mxu1 %v4385_v6  ;;  %3927 = vmatprep.subr.bf16.mxu0 %v4386_v7  ;;  %v224_v6 = vld [vmem:[%s5379_s0 + $0xa8] sm:$0xff] }
  0x42   : > { %3955 = vmatprep.subr.bf16.mxu1 %v4387_v8  ;;  %v3549_v7 = vcombine.low %v208_v5, %v224_v6  ;;  %v3550_v8 = vcombine.high %v208_v5, %v224_v6  ;;  %v241_v5 = vld [vmem:[%s5379_s0 + $0x130] sm:$0xff] }
  0x43   : > { %v257_v6 = vld [vmem:[%s5379_s0 + $0x1b0] sm:$0xff] }
  0x44   : > { %3928 = vmatpush3.bf16.msra.mxu0 %v4388_v9  ;;  %v4434_v9 = vld [vmem:[%s4687_s27 + $0x378] sm:$0xff]  }
  0x45   : > { %3956 = vmatpush3.bf16.msra.mxu1 %v4389_v10  ;;  %3929 = vmatprep.subr.bf16.mxu0 %v4390_v11  ;;  %v4435_v10 = vld [vmem:[%s4687_s27 + $0x3f8] sm:$0xff]  }
  0x46   : > { %3957 = vmatprep.subr.bf16.mxu1 %v4391_v12  ;;  %v4436_v11 = vld [vmem:[%s4687_s27 + $0x338] sm:$0xff]  }
  0x47   : > { %v4437_v12 = vld [vmem:[%s4687_s27 + $0x3b8] sm:$0xff]  }
  0x48   : > { %3930 = vmatpush3.bf16.msra.mxu0 %v4392_v13  ;;  %v4438_v13 = vld [vmem:[%s4687_s27 + $0x370] sm:$0xff]  }
  0x49   : > { %3958 = vmatpush3.bf16.msra.mxu1 %v4393_v14  ;;  %3931 = vmatprep.subr.bf16.mxu0 %v4394_v15  ;;  %v4439_v14 = vld [vmem:[%s4687_s27 + $0x3f0] sm:$0xff]  }
  0x4a   : > { %3959 = vmatprep.subr.bf16.mxu1 %v4395_v16  ;;  %v4440_v15 = vld [vmem:[%s4687_s27 + $0x330] sm:$0xff]  }
  0x4b   : > { %v4441_v16 = vld [vmem:[%s4687_s27 + $0x3b0] sm:$0xff]  }
  0x4c   : > { %3932 = vmatpush3.bf16.msra.mxu0 %v4396_v17  ;;  %v239_v17 = vld [vmem:[%s5379_s0 + $0x120] sm:$0xff] }
  0x4d   : > { %3960 = vmatpush3.bf16.msra.mxu1 %v4397_v18  ;;  %3933 = vmatprep.subr.bf16.mxu0 %v4398_v19  ;;  %v255_v18 = vld [vmem:[%s5379_s0 + $0x1a0] sm:$0xff] }
  0x4e   : > { %3961 = vmatprep.subr.bf16.mxu1 %v4399_v22  ;;  %v3580_v19 = vcombine.high %v239_v17, %v255_v18  ;;  %v3579_v20 = vcombine.low %v239_v17, %v255_v18  ;;  %v4443_v22 = vld [vmem:[%s4687_s27 + $0x3e8] sm:$0xff]   ;;  %v4478_v17 = vld [vmem:[%s4687_s27 + $0x460] sm:$0xff]  }
  0x4f   : > { %v4479_v18 = vld [vmem:[%s4687_s27 + $0x4e0] sm:$0xff]  }
  0x50   : > { %3934 = vmatpush3.bf16.msra.mxu0 %v4400_v25  ;;  %v256_v25 = vld [vmem:[%s5379_s0 + $0x1a8] sm:$0xff] }
  0x51   : > { %3962 = vmatpush3.bf16.msra.mxu1 %v4401_v26  ;;  %3975 = vmatprep.subr.bf16.mxu0 %v4402_v29  ;;  %v3582_v26 = vcombine.high %v240_v24, %v256_v25  ;;  %v4445_v29 = vld [vmem:[%s4687_s27 + $0x3a8] sm:$0xff]  }
  0x52   : > { %4003 = vmatprep.subr.bf16.mxu1 %v4403_v30  ;;  %v4446_v30 = vld [vmem:[%s4687_s27 + $0x360] sm:$0xff]  }
  0x53   : > { %2790 = vmatmul.mubr.bf16.vlgmr.msra.gmra.mxu0 %v3543_v27  ;;  %v4444_v27 = vld [vmem:[%s4687_s27 + $0x328] sm:$0xff]  }
  0x54   : > { %2839 = vmatmul.mubr.bf16.vlgmr.msra.gmra.mxu1 %v3545_v28  ;;  %3976 = vmatpush3.bf16.msra.mxu0 %v4404_v32  ;;  %v3581_v28 = vcombine.low %v240_v24, %v256_v25  ;;  %v780_v32 = vld [vmem:[%s5381_s2 + $0x8] sm:$0xff]  ;;  %v4485_v24 = vld [vmem:[%s4687_s27 + $0x498] sm:$0xff]   ;;  %v4486_v25 = vld [vmem:[%s4687_s27 + $0x450] sm:$0xff]  }
  0x55   : > { %4004 = vmatpush3.bf16.msra.mxu1 %v4405_v34  ;;  %2797 = vmatprep.mubr.bf16.mxu0 %v3576_v31  ;;  %v4447_v31 = vld [vmem:[%s4687_s27 + $0x3e0] sm:$0xff]  }
  0x56   : > { %3977 = vmatprep.subr.bf16.mxu0 %v4406_v35  ;;  %2846 = vmatprep.mubr.bf16.mxu1 %v3578_v33  ;;  %v4448_v33 = vld [vmem:[%s4687_s27 + $0x320] sm:$0xff]   ;;  %v4450_v35 = vld [vmem:[%s4687_s27 + $0x358] sm:$0xff]  }
  0x57   : > { %4005 = vmatprep.subr.bf16.mxu1 %v4407_v38  ;;  %790 = vperm.xlu0 %4336, %v780_v32   ;;  %v4449_v34 = vld [vmem:[%s4687_s27 + $0x3a0] sm:$0xff]   ;;  %v4453_v38 = vld [vmem:[%s4687_s27 + $0x398] sm:$0xff]   ;;  %v4493_v32 = vld [vmem:[%s4687_s27 + $0x488] sm:$0xff]  }
  0x58   : > { %3978 = vmatpush3.bf16.msra.mxu0 %v4408_v39  ;;  %v4454_v39 = vld [vmem:[%s4687_s27 + $0x350] sm:$0xff]  }
  0x59   : > { %4006 = vmatpush3.bf16.msra.mxu1 %v4409_v40  ;;  %3979 = vmatprep.subr.bf16.mxu0 %v4410_v42  ;;  %v4455_v40 = vld [vmem:[%s4687_s27 + $0x3d0] sm:$0xff]  }
  0x5a   : > { %4007 = vmatprep.subr.bf16.mxu1 %v4411_v44  ;;  %v4457_v42 = vld [vmem:[%s4687_s27 + $0x390] sm:$0xff]   ;;  %v4459_v44 = vld [vmem:[%s4687_s27 + $0x3c8] sm:$0xff]  }
  0x5b   : > { %2798 = vmatmul.mubr.bf16.gmra.mxu0 %v3575_v41  ;;  %v4456_v41 = vld [vmem:[%s4687_s27 + $0x310] sm:$0xff]  }
  0x5c   : > { %3980 = vmatpush3.bf16.msra.mxu0 %v4412_v46  ;;  %2847 = vmatmul.mubr.bf16.gmra.mxu1 %v3577_v43  ;;  %v4458_v43 = vld [vmem:[%s4687_s27 + $0x348] sm:$0xff]  }
  0x5d   : > { %4008 = vmatpush3.bf16.msra.mxu1 %v4413_v47  ;;  %2887 = vmatprep.mubr.bf16.mxu0 %v3548_v45  ;;  %v4460_v45 = vld [vmem:[%s4687_s27 + $0x308] sm:$0xff]   ;;  %v781_v47 = vld [vmem:[%s5381_s2 + $0x10] sm:$0xff] }
  0x5e   : > { %3981 = vmatprep.subr.bf16.mxu0 %v4414_v48  ;;  %4009 = vmatprep.subr.bf16.mxu1 %v4415_v49  ;;  %v4461_v46 = vld [vmem:[%s4687_s27 + $0x388] sm:$0xff]   ;;  %v4462_v48 = vld [vmem:[%s4687_s27 + $0x340] sm:$0xff]  }
  0x5f   : > { %2936 = vmatprep.mubr.bf16.mxu1 %v3550_v8  ;;  %795 = vperm.xlu1 %4337, %v781_v47   ;;  %v4463_v49 = vld [vmem:[%s4687_s27 + $0x3c0] sm:$0xff]   ;;  %v3583_v8 = vcombine.low %v241_v5, %v257_v6  ;;  %v4500_v47 = vld [vmem:[%s4687_s27 + $0x538] sm:$0xff]  }
  0x60   : > { %3982 = vmatpush3.bf16.msra.mxu0 %v4416_v50  ;;  %v4464_v50 = vld [vmem:[%s4687_s27 + $0x300] sm:$0xff]  }
  0x61   : > { %4010 = vmatpush3.bf16.msra.mxu1 %v4417_v51  ;;  %3983 = vmatprep.subr.bf16.mxu0 %v4418_v52  ;;  %v4465_v51 = vld [vmem:[%s4687_s27 + $0x380] sm:$0xff]   ;;  %v209_v52 = vld [vmem:[%s5379_s0 + $0x30] sm:$0xff] }
  0x62   : > { %4011 = vmatprep.subr.bf16.mxu1 %v4419_v53  ;;  %v225_v53 = vld [vmem:[%s5379_s0 + $0xb0] sm:$0xff] }
  0x64   : > { %3984 = vmatpush3.bf16.msra.mxu0 %v4420_v54  ;;  %v210_v54 = vld [vmem:[%s5379_s0 + $0x38] sm:$0xff] }
  0x65   : > { %4012 = vmatpush3.bf16.msra.mxu1 %v4421_v55  ;;  %3985 = vmatprep.subr.bf16.mxu0 %v4422_v56  ;;  %v3551_v55 = vcombine.low %v209_v52, %v225_v53  ;;  %v3552_v56 = vcombine.high %v209_v52, %v225_v53  ;;  %v4505_v52 = vld [vmem:[%s4687_s27 + $0x5b0] sm:$0xff]   ;;  %v243_v53 = vld [vmem:[%s5379_s0 + $0x140] sm:$0xff] }
  0x66   : > { %4013 = vmatprep.subr.bf16.mxu1 %v4423_v57  ;;  %v226_v57 = vld [vmem:[%s5379_s0 + $0xb8] sm:$0xff] }
  0x68   : > { %3986 = vmatpush3.bf16.msra.mxu0 %v4424_v58  ;;  %v782_v58 = vld [vmem:[%s5381_s2 + $0x18] sm:$0xff] }
  0x69   : > { %4014 = vmatpush3.bf16.msra.mxu1 %v4425_v59  ;;  %3987 = vmatprep.subr.bf16.mxu0 %v4426_v60  ;;  %v3553_v59 = vcombine.low %v210_v54, %v226_v57  ;;  %v3554_v60 = vcombine.high %v210_v54, %v226_v57  ;;  %v259_v54 = vld [vmem:[%s5379_s0 + $0x1c0] sm:$0xff]  ;;  %v4506_v57 = vld [vmem:[%s4687_s27 + $0x568] sm:$0xff]  }
  0x6a   : > { %4015 = vmatprep.subr.bf16.mxu1 %v4427_v61  ;;  %800 = vperm.xlu1 %4337, %v782_v58   ;;  %v4466_v61 = vld [vmem:[%s4687_s27 + $0x478] sm:$0xff]   ;;  %v4507_v58 = vld [vmem:[%s4687_s27 + $0x5e8] sm:$0xff]  }
  0x6c   : > { %3988 = vmatpush3.bf16.msra.mxu0 %v4428_v62  ;;  %v4467_v62 = vld [vmem:[%s4687_s27 + $0x4f8] sm:$0xff]  }
  0x6d   : > { %4016 = vmatpush3.bf16.msra.mxu1 %v4429_v63  ;;  %3989 = vmatprep.subr.bf16.mxu0 %v4430_v0  ;;  %v4468_v63 = vld [vmem:[%s4687_s27 + $0x438] sm:$0xff]  }
  0x6e   : > { %4017 = vmatprep.subr.bf16.mxu1 %v4431_v1  ;;  %v4469_v0 = vld [vmem:[%s4687_s27 + $0x4b8] sm:$0xff]   ;;  %v4470_v1 = vld [vmem:[%s4687_s27 + $0x470] sm:$0xff]  }
  0x70   : > { %3990 = vmatpush3.bf16.msra.mxu0 %v4432_v2  ;;  %v4471_v2 = vld [vmem:[%s4687_s27 + $0x4f0] sm:$0xff]  }
  0x71   : > { %4018 = vmatpush3.bf16.msra.mxu1 %v4433_v3  ;;  %4031 = vmatprep.subr.bf16.mxu0 %v4434_v9  ;;  %v4472_v3 = vld [vmem:[%s4687_s27 + $0x430] sm:$0xff]   ;;  %v4474_v9 = vld [vmem:[%s4687_s27 + $0x468] sm:$0xff]  }
  0x72   : > { %4059 = vmatprep.subr.bf16.mxu1 %v4435_v10  ;;  %v4475_v10 = vld [vmem:[%s4687_s27 + $0x4e8] sm:$0xff]  }
  0x73   : > { %2888 = vmatmul.mubr.bf16.vlgmr.msra.gmra.mxu0 %v3547_v4  ;;  %v4473_v4 = vld [vmem:[%s4687_s27 + $0x4b0] sm:$0xff]  }
  0x74   : > { %2937 = vmatmul.mubr.bf16.vlgmr.msra.gmra.mxu1 %v3549_v7  ;;  %4032 = vmatpush3.bf16.msra.mxu0 %v4436_v11  ;;  %v3584_v7 = vcombine.high %v241_v5, %v257_v6  ;;  %v242_v11 = vld [vmem:[%s5379_s0 + $0x138] sm:$0xff] }
  0x75   : > { %4060 = vmatpush3.bf16.msra.mxu1 %v4437_v12  ;;  %4033 = vmatprep.subr.bf16.mxu0 %v4438_v13  ;;  %v258_v12 = vld [vmem:[%s5379_s0 + $0x1b8] sm:$0xff] }
  0x76   : > { %4061 = vmatprep.subr.bf16.mxu1 %v4439_v14  ;;  %2895 = vmatprep.mubr.bf16.mxu0 %v3580_v19  ;;  %v3586_v13 = vcombine.high %v242_v11, %v258_v12  ;;  %v4476_v14 = vld [vmem:[%s4687_s27 + $0x428] sm:$0xff]   ;;  %v4480_v19 = vld [vmem:[%s4687_s27 + $0x420] sm:$0xff]   ;;  %v4514_v5 = vld [vmem:[%s4687_s27 + $0x558] sm:$0xff]  }
  0x77   : > { %2944 = vmatprep.mubr.bf16.mxu1 %v3582_v26  ;;  %v4487_v26 = vld [vmem:[%s4687_s27 + $0x4d0] sm:$0xff]   ;;  %v4515_v6 = vld [vmem:[%s4687_s27 + $0x5d8] sm:$0xff]  }
  0x78   : > { %4034 = vmatpush3.bf16.msra.mxu0 %v4440_v15  ;;  %v3585_v15 = vcombine.low %v242_v11, %v258_v12  ;;  %v4520_v11 = vld [vmem:[%s4687_s27 + $0x510] sm:$0xff]  }
  0x79   : > { %4062 = vmatpush3.bf16.msra.mxu1 %v4441_v16  ;;  %4035 = vmatprep.subr.bf16.mxu0 %v4442_v21  ;;  %v4477_v16 = vld [vmem:[%s4687_s27 + $0x4a8] sm:$0xff]   ;;  %v4482_v21 = vld [vmem:[%s4687_s27 + $0x458] sm:$0xff]   ;;  %v4521_v12 = vld [vmem:[%s4687_s27 + $0x590] sm:$0xff]  }
  0x7a   : > { %4063 = vmatprep.subr.bf16.mxu1 %v4443_v22  ;;  %v4483_v22 = vld [vmem:[%s4687_s27 + $0x4d8] sm:$0xff]  }
  0x7b   : > { %2896 = vmatmul.mubr.bf16.gmra.mxu0 %v3579_v20  ;;  %v4481_v20 = vld [vmem:[%s4687_s27 + $0x4a0] sm:$0xff]  }
  0x7c   : > { %4036 = vmatpush3.bf16.msra.mxu0 %v4444_v27  ;;  %2945 = vmatmul.mubr.bf16.gmra.mxu1 %v3581_v28  ;;  %v4488_v27 = vld [vmem:[%s4687_s27 + $0x410] sm:$0xff]  }
  0x7d   : > { %4064 = vmatpush3.bf16.msra.mxu1 %v4445_v29  ;;  %4037 = vmatprep.subr.bf16.mxu0 %v4446_v30  ;;  %v4489_v28 = vld [vmem:[%s4687_s27 + $0x490] sm:$0xff]   ;;  %v4490_v29 = vld [vmem:[%s4687_s27 + $0x448] sm:$0xff]  }
  0x7e   : > { %4065 = vmatprep.subr.bf16.mxu1 %v4447_v31  ;;  %2985 = vmatprep.mubr.bf16.mxu0 %v3552_v56  ;;  %v4491_v30 = vld [vmem:[%s4687_s27 + $0x4c8] sm:$0xff]   ;;  %v3587_v56 = vcombine.low %v243_v53, %v259_v54 }
  0x7f   : > { %3034 = vmatprep.mubr.bf16.mxu1 %v3554_v60  ;;  %v4492_v31 = vld [vmem:[%s4687_s27 + $0x408] sm:$0xff]  }
  0x80   : > { %4038 = vmatpush3.bf16.msra.mxu0 %v4448_v33  ;;  %v4494_v33 = vld [vmem:[%s4687_s27 + $0x440] sm:$0xff]   ;;  %v260_v60 = vld [vmem:[%s5379_s0 + $0x1c8] sm:$0xff] }
  0x81   : > { %4066 = vmatpush3.bf16.msra.mxu1 %v4449_v34  ;;  %4039 = vmatprep.subr.bf16.mxu0 %v4450_v35  ;;  %v4495_v34 = vld [vmem:[%s4687_s27 + $0x4c0] sm:$0xff]  }
  0x82   : > { %4067 = vmatprep.subr.bf16.mxu1 %v4451_v36  ;;  %v4496_v35 = vld [vmem:[%s4687_s27 + $0x400] sm:$0xff]  }
  0x83   : > { %v4497_v36 = vld [vmem:[%s4687_s27 + $0x480] sm:$0xff]  }
  0x84   : > { %4040 = vmatpush3.bf16.msra.mxu0 %v4452_v37  ;;  %v211_v37 = vld [vmem:[%s5379_s0 + $0x40] sm:$0xff] }
  0x85   : > { %4068 = vmatpush3.bf16.msra.mxu1 %v4453_v38  ;;  %4041 = vmatprep.subr.bf16.mxu0 %v4454_v39  ;;  %v227_v38 = vld [vmem:[%s5379_s0 + $0xc0] sm:$0xff]  ;;  %v212_v39 = vld [vmem:[%s5379_s0 + $0x48] sm:$0xff] }
  0x86   : > { %4069 = vmatprep.subr.bf16.mxu1 %v4455_v40  ;;  %v3555_v40 = vcombine.low %v211_v37, %v227_v38 }
  0x88   : > { %4042 = vmatpush3.bf16.msra.mxu0 %v4456_v41  ;;  %v3556_v41 = vcombine.high %v211_v37, %v227_v38  ;;  %v245_v37 = vld [vmem:[%s5379_s0 + $0x150] sm:$0xff] }
  0x89   : > { %4070 = vmatpush3.bf16.msra.mxu1 %v4457_v42  ;;  %4043 = vmatprep.subr.bf16.mxu0 %v4458_v43  ;;  %v228_v42 = vld [vmem:[%s5379_s0 + $0xc8] sm:$0xff]  ;;  %v261_v38 = vld [vmem:[%s5379_s0 + $0x1d0] sm:$0xff] }
  0x8a   : > { %4071 = vmatprep.subr.bf16.mxu1 %v4459_v44  ;;  %v3557_v43 = vcombine.low %v212_v39, %v228_v42  ;;  %v3558_v44 = vcombine.high %v212_v39, %v228_v42  ;;  %v3592_v39 = vcombine.high %v245_v37, %v261_v38  ;;  %v4539_v42 = vld [vmem:[%s4687_s27 + $0x6e8] sm:$0xff]  }
  0x8c   : > { %4044 = vmatpush3.bf16.msra.mxu0 %v4460_v45  ;;  %v4498_v45 = vld [vmem:[%s4687_s27 + $0x578] sm:$0xff]  }
  0x8d   : > { %4072 = vmatpush3.bf16.msra.mxu1 %v4461_v46  ;;  %4045 = vmatprep.subr.bf16.mxu0 %v4462_v48  ;;  %v4499_v46 = vld [vmem:[%s4687_s27 + $0x5f8] sm:$0xff]  }
  0x8e   : > { %4073 = vmatprep.subr.bf16.mxu1 %v4463_v49  ;;  %v4501_v48 = vld [vmem:[%s4687_s27 + $0x5b8] sm:$0xff]   ;;  %v4502_v49 = vld [vmem:[%s4687_s27 + $0x570] sm:$0xff]  }
  0x90   : > { %4046 = vmatpush3.bf16.msra.mxu0 %v4464_v50  ;;  %v4503_v50 = vld [vmem:[%s4687_s27 + $0x5f0] sm:$0xff]  }
  0x91   : > { %4074 = vmatpush3.bf16.msra.mxu1 %v4465_v51  ;;  %4087 = vmatprep.subr.bf16.mxu0 %v4466_v61  ;;  %v4504_v51 = vld [vmem:[%s4687_s27 + $0x530] sm:$0xff]  }
  0x92   : > { %4115 = vmatprep.subr.bf16.mxu1 %v4467_v62  ;;  %v4508_v62 = vld [vmem:[%s4687_s27 + $0x528] sm:$0xff]  }
  0x93   : > { %2986 = vmatmul.mubr.bf16.vlgmr.msra.gmra.mxu0 %v3551_v55  ;;  %v3588_v55 = vcombine.high %v243_v53, %v259_v54  ;;  %v4546_v53 = vld [vmem:[%s4687_s27 + $0x658] sm:$0xff]  }
  0x94   : > { %3035 = vmatmul.mubr.bf16.vlgmr.msra.gmra.mxu1 %v3553_v59  ;;  %4088 = vmatpush3.bf16.msra.mxu0 %v4468_v63  ;;  %v244_v59 = vld [vmem:[%s5379_s0 + $0x148] sm:$0xff]  ;;  %v4547_v54 = vld [vmem:[%s4687_s27 + $0x6d8] sm:$0xff]  }
  0x95   : > { %4116 = vmatpush3.bf16.msra.mxu1 %v4469_v0  ;;  %4089 = vmatprep.subr.bf16.mxu0 %v4470_v1  ;;  %v3590_v61 = vcombine.high %v244_v59, %v260_v60  ;;  %v3589_v63 = vcombine.low %v244_v59, %v260_v60  ;;  %v4509_v0 = vld [vmem:[%s4687_s27 + $0x5a8] sm:$0xff]   ;;  %v4510_v1 = vld [vmem:[%s4687_s27 + $0x560] sm:$0xff]   ;;  %v4552_v59 = vld [vmem:[%s4687_s27 + $0x610] sm:$0xff]  }
  0x96   : > { %4117 = vmatprep.subr.bf16.mxu1 %v4471_v2  ;;  %2993 = vmatprep.mubr.bf16.mxu0 %v3584_v7  ;;  %v4511_v2 = vld [vmem:[%s4687_s27 + $0x5e0] sm:$0xff]   ;;  %v4516_v7 = vld [vmem:[%s4687_s27 + $0x518] sm:$0xff]   ;;  %v4553_v60 = vld [vmem:[%s4687_s27 + $0x690] sm:$0xff]  }
  0x97   : > { %3042 = vmatprep.mubr.bf16.mxu1 %v3586_v13  ;;  %v4522_v13 = vld [vmem:[%s4687_s27 + $0x548] sm:$0xff]  }
  0x98   : > { %4090 = vmatpush3.bf16.msra.mxu0 %v4472_v3  ;;  %v4512_v3 = vld [vmem:[%s4687_s27 + $0x520] sm:$0xff]  }
  0x99   : > { %4118 = vmatpush3.bf16.msra.mxu1 %v4473_v4  ;;  %4091 = vmatprep.subr.bf16.mxu0 %v4474_v9  ;;  %v4513_v4 = vld [vmem:[%s4687_s27 + $0x5a0] sm:$0xff]   ;;  %v4518_v9 = vld [vmem:[%s4687_s27 + $0x550] sm:$0xff]  }
  0x9a   : > { %4119 = vmatprep.subr.bf16.mxu1 %v4475_v10  ;;  %v4519_v10 = vld [vmem:[%s4687_s27 + $0x5d0] sm:$0xff]  }
  0x9b   : > { %2994 = vmatmul.mubr.bf16.gmra.mxu0 %v3583_v8  ;;  %v4517_v8 = vld [vmem:[%s4687_s27 + $0x598] sm:$0xff]  }
  0x9c   : > { %4092 = vmatpush3.bf16.msra.mxu0 %v4476_v14  ;;  %3043 = vmatmul.mubr.bf16.gmra.mxu1 %v3585_v15  ;;  %v4523_v14 = vld [vmem:[%s4687_s27 + $0x5c8] sm:$0xff]  }
  0x9d   : > { %4120 = vmatpush3.bf16.msra.mxu1 %v4477_v16  ;;  %4093 = vmatprep.subr.bf16.mxu0 %v4478_v17  ;;  %v4524_v15 = vld [vmem:[%s4687_s27 + $0x508] sm:$0xff]   ;;  %v4526_v17 = vld [vmem:[%s4687_s27 + $0x540] sm:$0xff]  }
  0x9e   : > { %4121 = vmatprep.subr.bf16.mxu1 %v4479_v18  ;;  %3083 = vmatprep.mubr.bf16.mxu0 %v3556_v41  ;;  %v4525_v16 = vld [vmem:[%s4687_s27 + $0x588] sm:$0xff]   ;;  %v4527_v18 = vld [vmem:[%s4687_s27 + $0x5c0] sm:$0xff]  }
  0x9f   : > { %3132 = vmatprep.mubr.bf16.mxu1 %v3558_v44  ;;  %v4538_v41 = vld [vmem:[%s4687_s27 + $0x668] sm:$0xff]   ;;  %v262_v44 = vld [vmem:[%s5379_s0 + $0x1d8] sm:$0xff] }
  0xa0   : > { %4094 = vmatpush3.bf16.msra.mxu0 %v4480_v19  ;;  %v4528_v19 = vld [vmem:[%s4687_s27 + $0x500] sm:$0xff]  }
  0xa1   : > { %4122 = vmatpush3.bf16.msra.mxu1 %v4481_v20  ;;  %4095 = vmatprep.subr.bf16.mxu0 %v4482_v21  ;;  %v4529_v20 = vld [vmem:[%s4687_s27 + $0x580] sm:$0xff]   ;;  %v213_v21 = vld [vmem:[%s5379_s0 + $0x50] sm:$0xff] }
  0xa2   : > { %4123 = vmatprep.subr.bf16.mxu1 %v4483_v22  ;;  %v229_v22 = vld [vmem:[%s5379_s0 + $0xd0] sm:$0xff] }
  0xa4   : > { %4096 = vmatpush3.bf16.msra.mxu0 %v4484_v23  ;;  %v214_v23 = vld [vmem:[%s5379_s0 + $0x58] sm:$0xff] }
  0xa5   : > { %4124 = vmatpush3.bf16.msra.mxu1 %v4485_v24  ;;  %4097 = vmatprep.subr.bf16.mxu0 %v4486_v25  ;;  %v230_v24 = vld [vmem:[%s5379_s0 + $0xd8] sm:$0xff]  ;;  %v3559_v25 = vcombine.low %v213_v21, %v229_v22 }
  0xa6   : > { %4125 = vmatprep.subr.bf16.mxu1 %v4487_v26  ;;  %v3560_v26 = vcombine.high %v213_v21, %v229_v22 }
  0xa8   : > { %4098 = vmatpush3.bf16.msra.mxu0 %v4488_v27  ;;  %v3561_v27 = vcombine.low %v214_v23, %v230_v24 }
  0xa9   : > { %4126 = vmatpush3.bf16.msra.mxu1 %v4489_v28  ;;  %4099 = vmatprep.subr.bf16.mxu0 %v4490_v29  ;;  %v3562_v28 = vcombine.high %v214_v23, %v230_v24  ;;  %v4530_v29 = vld [vmem:[%s4687_s27 + $0x678] sm:$0xff]   ;;  %v216_v24 = vld [vmem:[%s5379_s0 + $0x68] sm:$0xff] }
  0xaa   : > { %4127 = vmatprep.subr.bf16.mxu1 %v4491_v30  ;;  %v4531_v30 = vld [vmem:[%s4687_s27 + $0x6f8] sm:$0xff]  }
  0xac   : > { %4100 = vmatpush3.bf16.msra.mxu0 %v4492_v31  ;;  %v4532_v31 = vld [vmem:[%s4687_s27 + $0x638] sm:$0xff]  }
  0xad   : > { %4128 = vmatpush3.bf16.msra.mxu1 %v4493_v32  ;;  %4101 = vmatprep.subr.bf16.mxu0 %v4494_v33  ;;  %v4533_v32 = vld [vmem:[%s4687_s27 + $0x6b8] sm:$0xff]   ;;  %v4534_v33 = vld [vmem:[%s4687_s27 + $0x670] sm:$0xff]  }
  0xae   : > { %4129 = vmatprep.subr.bf16.mxu1 %v4495_v34  ;;  %v4535_v34 = vld [vmem:[%s4687_s27 + $0x6f0] sm:$0xff]  }
  0xb0   : > { %4102 = vmatpush3.bf16.msra.mxu0 %v4496_v35  ;;  %v4536_v35 = vld [vmem:[%s4687_s27 + $0x630] sm:$0xff]  }
  0xb1   : > { %4130 = vmatpush3.bf16.msra.mxu1 %v4497_v36  ;;  %4143 = vmatprep.subr.bf16.mxu0 %v4498_v45  ;;  %v4537_v36 = vld [vmem:[%s4687_s27 + $0x6b0] sm:$0xff]  }
  0xb2   : > { %4171 = vmatprep.subr.bf16.mxu1 %v4499_v46  ;;  %v4540_v46 = vld [vmem:[%s4687_s27 + $0x628] sm:$0xff]  }
  0xb3   : > { %3084 = vmatmul.mubr.bf16.vlgmr.msra.gmra.mxu0 %v3555_v40  ;;  %v3591_v40 = vcombine.low %v245_v37, %v261_v38  ;;  %v4564_v37 = vld [vmem:[%s4687_s27 + $0x738] sm:$0xff]  }
  0xb4   : > { %3133 = vmatmul.mubr.bf16.vlgmr.msra.gmra.mxu1 %v3557_v43  ;;  %4144 = vmatpush3.bf16.msra.mxu0 %v4500_v47  ;;  %v246_v43 = vld [vmem:[%s5379_s0 + $0x158] sm:$0xff] }
  0xb5   : > { %4172 = vmatpush3.bf16.msra.mxu1 %v4501_v48  ;;  %4145 = vmatprep.subr.bf16.mxu0 %v4502_v49  ;;  %v3594_v45 = vcombine.high %v246_v43, %v262_v44  ;;  %v3593_v47 = vcombine.low %v246_v43, %v262_v44  ;;  %v4541_v48 = vld [vmem:[%s4687_s27 + $0x6a8] sm:$0xff]   ;;  %v4542_v49 = vld [vmem:[%s4687_s27 + $0x660] sm:$0xff]   ;;  %v4566_v43 = vld [vmem:[%s4687_s27 + $0x770] sm:$0xff]  }
  0xb6   : > { %4173 = vmatprep.subr.bf16.mxu1 %v4503_v50  ;;  %3091 = vmatprep.mubr.bf16.mxu0 %v3588_v55  ;;  %v4543_v50 = vld [vmem:[%s4687_s27 + $0x6e0] sm:$0xff]   ;;  %v4548_v55 = vld [vmem:[%s4687_s27 + $0x618] sm:$0xff]  }
  0xb7   : > { %3140 = vmatprep.mubr.bf16.mxu1 %v3590_v61 }
  0xb8   : > { %4146 = vmatpush3.bf16.msra.mxu0 %v4504_v51  ;;  %v4544_v51 = vld [vmem:[%s4687_s27 + $0x620] sm:$0xff]  }
  0xb9   : > { %4174 = vmatpush3.bf16.msra.mxu1 %v4505_v52  ;;  %4147 = vmatprep.subr.bf16.mxu0 %v4506_v57  ;;  %v4545_v52 = vld [vmem:[%s4687_s27 + $0x6a0] sm:$0xff]   ;;  %v4550_v57 = vld [vmem:[%s4687_s27 + $0x650] sm:$0xff]  }
  0xba   : > { %4175 = vmatprep.subr.bf16.mxu1 %v4507_v58  ;;  %v4551_v58 = vld [vmem:[%s4687_s27 + $0x6d0] sm:$0xff]  }
  0xbb   : > { %3092 = vmatmul.mubr.bf16.gmra.mxu0 %v3587_v56  ;;  %v4549_v56 = vld [vmem:[%s4687_s27 + $0x698] sm:$0xff]  }
  0xbc   : > { %4148 = vmatpush3.bf16.msra.mxu0 %v4508_v62  ;;  %3141 = vmatmul.mubr.bf16.gmra.mxu1 %v3589_v63  ;;  %v4554_v62 = vld [vmem:[%s4687_s27 + $0x648] sm:$0xff]  }
  0xbd   : > { %4176 = vmatpush3.bf16.msra.mxu1 %v4509_v0  ;;  %4149 = vmatprep.subr.bf16.mxu0 %v4510_v1  ;;  %v4555_v0 = vld [vmem:[%s4687_s27 + $0x6c8] sm:$0xff]  }
  0xbe   : > { %4177 = vmatprep.subr.bf16.mxu1 %v4511_v2  ;;  %3181 = vmatprep.mubr.bf16.mxu0 %v3560_v26  ;;  %v4556_v2 = vld [vmem:[%s4687_s27 + $0x608] sm:$0xff]  }
  0xbf   : > { %3230 = vmatprep.mubr.bf16.mxu1 %v3562_v28 }
  0xc0   : > { %4150 = vmatpush3.bf16.msra.mxu0 %v4512_v3 }
  0xc1   : > { %4178 = vmatpush3.bf16.msra.mxu1 %v4513_v4  ;;  %4151 = vmatprep.subr.bf16.mxu0 %v4514_v5  ;;  %v4557_v5 = vld [vmem:[%s4687_s27 + $0x688] sm:$0xff]  }
  0xc2   : > { %4179 = vmatprep.subr.bf16.mxu1 %v4515_v6 }
  0xc4   : > { %4152 = vmatpush3.bf16.msra.mxu0 %v4516_v7 }
  0xc5   : > { %4180 = vmatpush3.bf16.msra.mxu1 %v4517_v8  ;;  %4153 = vmatprep.subr.bf16.mxu0 %v4518_v9  ;;  %v4558_v8 = vld [vmem:[%s4687_s27 + $0x640] sm:$0xff]  }
  0xc6   : > { %4181 = vmatprep.subr.bf16.mxu1 %v4519_v10  ;;  %v4559_v10 = vld [vmem:[%s4687_s27 + $0x6c0] sm:$0xff]  }
  0xc8   : > { %4154 = vmatpush3.bf16.msra.mxu0 %v4520_v11  ;;  %v786_v11 = vpop.permute.xlu0 %785 }
  0xc9   : > { %4182 = vmatpush3.bf16.msra.mxu1 %v4521_v12  ;;  %4155 = vmatprep.subr.bf16.mxu0 %v4522_v13  ;;  %v4560_v13 = vld [vmem:[%s4687_s27 + $0x600] sm:$0xff]  }
  0xca   : > { %4183 = vmatprep.subr.bf16.mxu1 %v4523_v14 }
  0xcc   : > { %4156 = vmatpush3.bf16.msra.mxu0 %v4524_v15 }
  0xcd   : > { %4184 = vmatpush3.bf16.msra.mxu1 %v4525_v16  ;;  %4157 = vmatprep.subr.bf16.mxu0 %v4526_v17  ;;  %v4561_v17 = vld [vmem:[%s4687_s27 + $0x680] sm:$0xff]  }
  0xce   : > { %4185 = vmatprep.subr.bf16.mxu1 %v4527_v18  ;;  %v215_v18 = vld [vmem:[%s5379_s0 + $0x60] sm:$0xff] }
  0xd0   : > { %4158 = vmatpush3.bf16.msra.mxu0 %v4528_v19  ;;  %v231_v19 = vld [vmem:[%s5379_s0 + $0xe0] sm:$0xff] }
  0xd1   : > { %4186 = vmatpush3.bf16.msra.mxu1 %v4529_v20  ;;  %4199 = vmatprep.subr.bf16.mxu0 %v4530_v29  ;;  %v3563_v22 = vcombine.low %v215_v18, %v231_v19  ;;  %v3564_v23 = vcombine.high %v215_v18, %v231_v19  ;;  %v4585_v18 = vld [vmem:[%s4687_s27 + $0x790] sm:$0xff]  }
  0xd2   : > { %4227 = vmatprep.subr.bf16.mxu1 %v4531_v30  ;;  %v4562_v30 = vld [vmem:[%s4687_s27 + $0x778] sm:$0xff]  }
  0xd3   : > { %3182 = vmatmul.mubr.bf16.vlgmr.msra.gmra.mxu0 %v3559_v25  ;;  %v232_v25 = vld [vmem:[%s5379_s0 + $0xe8] sm:$0xff] }
  0xd4   : > { %3231 = vmatmul.mubr.bf16.vlgmr.msra.gmra.mxu1 %v3561_v27  ;;  %4200 = vmatpush3.bf16.msra.mxu0 %v4532_v31  ;;  %v3565_v28 = vcombine.low %v216_v24, %v232_v25  ;;  %v3566_v29 = vcombine.high %v216_v24, %v232_v25  ;;  %v791_v31 = vpop.permute.xlu0 %790 }
  0xd5   : > { %4228 = vmatpush3.bf16.msra.mxu1 %v4533_v32  ;;  %4201 = vmatprep.subr.bf16.mxu0 %v4534_v33  ;;  %v4563_v33 = vld [vmem:[%s4687_s27 + $0x7f8] sm:$0xff]  }
  0xd6   : > { %4229 = vmatprep.subr.bf16.mxu1 %v4535_v34  ;;  %3189 = vmatprep.mubr.bf16.mxu0 %v3592_v39 }
  0xd7   : > { %3238 = vmatprep.mubr.bf16.mxu1 %v3594_v45  ;;  %v4567_v45 = vld [vmem:[%s4687_s27 + $0x7f0] sm:$0xff]  }
  0xd8   : > { %4202 = vmatpush3.bf16.msra.mxu0 %v4536_v35 }
  0xd9   : > { %4230 = vmatpush3.bf16.msra.mxu1 %v4537_v36  ;;  %4203 = vmatprep.subr.bf16.mxu0 %v4538_v41 }
  0xda   : > { %4231 = vmatprep.subr.bf16.mxu1 %v4539_v42 }
  0xdb   : > { %3190 = vmatmul.mubr.bf16.gmra.mxu0 %v3591_v40  ;;  %v4565_v40 = vld [vmem:[%s4687_s27 + $0x7b8] sm:$0xff]  }
  0xdc   : > { %4204 = vmatpush3.bf16.msra.mxu0 %v4540_v46  ;;  %3239 = vmatmul.mubr.bf16.gmra.mxu1 %v3593_v47 }
  0xdd   : > { %4232 = vmatpush3.bf16.msra.mxu1 %v4541_v48  ;;  %4205 = vmatprep.subr.bf16.mxu0 %v4542_v49  ;;  %v4568_v48 = vld [vmem:[%s4687_s27 + $0x730] sm:$0xff]  }
  0xde   : > { %4233 = vmatprep.subr.bf16.mxu1 %v4543_v50  ;;  %3279 = vmatprep.mubr.bf16.mxu0 %v3564_v23  ;;  %v4569_v50 = vld [vmem:[%s4687_s27 + $0x7b0] sm:$0xff]   ;;  %v4587_v23 = vld [vmem:[%s4687_s27 + $0x7c8] sm:$0xff]  }
  0xdf   : > { %3328 = vmatprep.mubr.bf16.mxu1 %v3566_v29 }
  0xe0   : > { %4206 = vmatpush3.bf16.msra.mxu0 %v4544_v51  ;;  %v247_v51 = vld [vmem:[%s5379_s0 + $0x160] sm:$0xff] }
  0xe1   : > { %4234 = vmatpush3.bf16.msra.mxu1 %v4545_v52  ;;  %4207 = vmatprep.subr.bf16.mxu0 %v4546_v53  ;;  %v263_v52 = vld [vmem:[%s5379_s0 + $0x1e0] sm:$0xff] }
  0xe2   : > { %4235 = vmatprep.subr.bf16.mxu1 %v4547_v54  ;;  %v3596_v53 = vcombine.high %v247_v51, %v263_v52  ;;  %v3595_v54 = vcombine.low %v247_v51, %v263_v52  ;;  %v234_v51 = vld [vmem:[%s5379_s0 + $0xf8] sm:$0xff]  ;;  %v249_v52 = vld [vmem:[%s5379_s0 + $0x170] sm:$0xff] }
  0xe4   : > { %4208 = vmatpush3.bf16.msra.mxu0 %v4548_v55  ;;  %v4570_v55 = vld [vmem:[%s4687_s27 + $0x768] sm:$0xff]  }
  0xe5   : > { %4236 = vmatpush3.bf16.msra.mxu1 %v4549_v56  ;;  %4209 = vmatprep.subr.bf16.mxu0 %v4550_v57  ;;  %v4571_v56 = vld [vmem:[%s4687_s27 + $0x7e8] sm:$0xff]  }
  0xe6   : > { %4237 = vmatprep.subr.bf16.mxu1 %v4551_v58  ;;  %v248_v57 = vld [vmem:[%s5379_s0 + $0x168] sm:$0xff] }
  0xe7   : > { %v264_v58 = vld [vmem:[%s5379_s0 + $0x1e8] sm:$0xff] }
  0xe8   : > { %4210 = vmatpush3.bf16.msra.mxu0 %v4552_v59  ;;  %v3598_v59 = vcombine.high %v248_v57, %v264_v58 }
  0xe9   : > { %4238 = vmatpush3.bf16.msra.mxu1 %v4553_v60  ;;  %4211 = vmatprep.subr.bf16.mxu0 %v4554_v62  ;;  %v4572_v60 = vld [vmem:[%s4687_s27 + $0x728] sm:$0xff]  }
  0xea   : > { %4239 = vmatprep.subr.bf16.mxu1 %v4555_v0  ;;  %v4573_v62 = vld [vmem:[%s4687_s27 + $0x7a8] sm:$0xff]   ;;  %v796_v0 = vpop.permute.xlu1 %795 }
  0xec   : > { %4212 = vmatpush3.bf16.msra.mxu0 %v4556_v2 }
  0xed   : > { %4240 = vmatpush3.bf16.msra.mxu1 %v4557_v5  ;;  %4213 = vmatprep.subr.bf16.mxu0 %v4558_v8  ;;  %v4580_v8 = vld [vmem:[%s4687_s27 + $0x718] sm:$0xff]  }
  0xee   : > { %4241 = vmatprep.subr.bf16.mxu1 %v4559_v10  ;;  %v4581_v10 = vld [vmem:[%s4687_s27 + $0x798] sm:$0xff]  }
  0xf0   : > { %4214 = vmatpush3.bf16.msra.mxu0 %v4560_v13  ;;  %v4583_v13 = vld [vmem:[%s4687_s27 + $0x7d0] sm:$0xff]  }
  0xf1   : > { %4242 = vmatpush3.bf16.msra.mxu1 %v4561_v17  ;;  %4255 = vmatprep.subr.bf16.mxu0 %v4562_v30  ;;  %v4589_v30 = vld [vmem:[%s4687_s27 + $0x788] sm:$0xff]  }
  0xf2   : > { %4283 = vmatprep.subr.bf16.mxu1 %v4563_v33 }
  0xf3   : > { %v3879_v61 = vpop.f32.mrf.mxu0  ;;  %3280 = vmatmul.mubr.bf16.vlgmr.msra.gmra.mxu0 %v3563_v22 }
  0xf4   : > { %v3907_v63 = vpop.f32.mrf.mxu1  ;;  %3329 = vmatmul.mubr.bf16.vlgmr.msra.gmra.mxu1 %v3565_v28  ;;  %4256 = vmatpush3.bf16.msra.mxu0 %v4564_v37 }
  0xf5   : > { %v3880_v1 = vpop.f32.mrf.mxu0  ;;  %4284 = vmatpush3.bf16.msra.mxu1 %v4565_v40  ;;  %4257 = vmatprep.subr.bf16.mxu0 %v4566_v43 }
  0xf6   : > { %v3881_v3 = vadd.f32 %v3880_v1, %v3879_v61  ;;  %v3908_v4 = vpop.f32.mrf.mxu1  ;;  %4285 = vmatprep.subr.bf16.mxu1 %v4567_v45  ;;  %3287 = vmatprep.mubr.bf16.mxu0 %v3596_v53  ;;  %v3597_v61 = vcombine.low %v248_v57, %v264_v58  ;;  %v4575_v1 = vld [vmem:[%s4687_s27 + $0x7e0] sm:$0xff]   ;;  %v233_v45 = vld [vmem:[%s5379_s0 + $0xf0] sm:$0xff] }
  0xf7   : > { %v3909_v6 = vadd.f32 %v3908_v4, %v3907_v63  ;;  %v3882_v7 = vpop.f32.mrf.mxu0  ;;  %3336 = vmatprep.mubr.bf16.mxu1 %v3598_v59  ;;  %v4574_v63 = vld [vmem:[%s4687_s27 + $0x760] sm:$0xff]   ;;  %v265_v53 = vld [vmem:[%s5379_s0 + $0x1f0] sm:$0xff]  ;;  %v250_v59 = vld [vmem:[%s5379_s0 + $0x178] sm:$0xff] }
  0xf8   : > { %v3910_v9 = vpop.f32.mrf.mxu1  ;;  %v2694_v14 = vadd.f32 %v3881_v3, %v786_v11  ;;  %4258 = vmatpush3.bf16.msra.mxu0 %v4568_v48  ;;  %v4576_v3 = vld [vmem:[%s4687_s27 + $0x720] sm:$0xff]   ;;  %v3600_v58 = vcombine.high %v249_v52, %v265_v53 }
  0xf9   : > { %v3883_v12 = vpop.f32.mrf.mxu0  ;;  %4286 = vmatpush3.bf16.msra.mxu1 %v4569_v50  ;;  %4259 = vmatprep.subr.bf16.mxu0 %v4570_v55  ;;  %v4577_v4 = vld [vmem:[%s4687_s27 + $0x7a0] sm:$0xff]  }
  0xfa   : > { %v3884_v15 = vadd.f32 %v3883_v12, %v3882_v7  ;;  %v3911_v16 = vpop.f32.mrf.mxu1  ;;  %v5097_v26 = vadd.f32 %v3909_v6, %v2694_v14  ;;  %4287 = vmatprep.subr.bf16.mxu1 %v4571_v56  ;;  %v4578_v6 = vld [vmem:[%s4687_s27 + $0x758] sm:$0xff]   ;;  %v4582_v12 = vld [vmem:[%s4687_s27 + $0x750] sm:$0xff]  }
  0xfb   : > { %v3912_v20 = vadd.f32 %v3911_v16, %v3910_v9  ;;  %v3885_v21 = vpop.f32.mrf.mxu0  ;;  %3288 = vmatmul.mubr.bf16.gmra.mxu0 %v3595_v54  ;;  %v4579_v7 = vld [vmem:[%s4687_s27 + $0x7d8] sm:$0xff]   ;;  %v801_v9 = vpop.permute.xlu1 %800  ;;  %v4584_v16 = vld [vmem:[%s4687_s27 + $0x710] sm:$0xff]  }
  0xfc   : > { %v3913_v27 = vpop.f32.mrf.mxu1  ;;  %v2697_v34 = vadd.f32 %v3884_v15, %v791_v31  ;;  %4260 = vmatpush3.bf16.msra.mxu0 %v4572_v60  ;;  %3337 = vmatmul.mubr.bf16.gmra.mxu1 %v3597_v61  ;;  %v266_v60 = vld [vmem:[%s5379_s0 + $0x1f8] sm:$0xff] }
  0xfd   : > { %v3886_v32 = vpop.f32.mrf.mxu0  ;;  %4288 = vmatpush3.bf16.msra.mxu1 %v4573_v62  ;;  %4261 = vmatprep.subr.bf16.mxu0 %v4574_v63  ;;  %v3602_v62 = vcombine.high %v250_v59, %v266_v60 }
  0xfe   : > { %v3887_v35 = vadd.f32 %v3886_v32, %v3885_v21  ;;  %v3914_v36 = vpop.f32.mrf.mxu1  ;;  %v5103_v41 = vadd.f32 %v3912_v20, %v2697_v34  ;;  %4289 = vmatprep.subr.bf16.mxu1 %v4575_v1  ;;  %v4586_v20 = vld [vmem:[%s4687_s27 + $0x748] sm:$0xff]   ;;  %v4590_v32 = vld [vmem:[%s4687_s27 + $0x740] sm:$0xff]  }
  0xff   : > { %v3888_v38 = vpop.f32.mrf.mxu0  ;;  %v3915_v39 = vadd.f32 %v3914_v36, %v3913_v27  ;;  %v4588_v27 = vld [vmem:[%s4687_s27 + $0x708] sm:$0xff]   ;;  %v4591_v36 = vld [vmem:[%s4687_s27 + $0x7c0] sm:$0xff]  }
 0x100   : > { %v3916_v42 = vpop.f32.mrf.mxu1  ;;  %v2702_v2 = vadd.f32 %v3887_v35, %v796_v0  ;;  %4262 = vmatpush3.bf16.msra.mxu0 %v4576_v3 }
 0x101   : > { %v3889_v44 = vpop.f32.mrf.mxu0  ;;  %4290 = vmatpush3.bf16.msra.mxu1 %v4577_v4  ;;  %4263 = vmatprep.subr.bf16.mxu0 %v4578_v6 }
 0x102   : > { %v3890_v46 = vadd.f32 %v3889_v44, %v3888_v38  ;;  %v3917_v47 = vpop.f32.mrf.mxu1  ;;  %v5129_v5 = vadd.f32 %v3915_v39, %v2702_v2  ;;  %4291 = vmatprep.subr.bf16.mxu1 %v4579_v7  ;;  %v4592_v39 = vld [vmem:[%s4687_s27 + $0x700] sm:$0xff]   ;;  %v217_v44 = vld [vmem:[%s5379_s0 + $0x70] sm:$0xff]  ;;  %v3599_v7 = vcombine.low %v249_v52, %v265_v53 }
 0x103   : > { %v3918_v49 = vadd.f32 %v3917_v47, %v3916_v42  ;;  %v4593_v42 = vld [vmem:[%s4687_s27 + $0x780] sm:$0xff]   ;;  %v3568_v50 = vcombine.high %v217_v44, %v233_v45 }
 0x104   : > { %v2705_v11 = vadd.f32 %v3890_v46, %v801_v9  ;;  %4264 = vmatpush3.bf16.msra.mxu0 %v4580_v8  ;;  %v218_v46 = vld [vmem:[%s5379_s0 + $0x78] sm:$0xff]  ;;  %v3601_v9 = vcombine.low %v250_v59, %v266_v60 }
 0x105   : > { %4292 = vmatpush3.bf16.msra.mxu1 %v4581_v10  ;;  %4265 = vmatprep.subr.bf16.mxu0 %v4582_v12  ;;  %v3569_v56 = vcombine.low %v218_v46, %v234_v51  ;;  %v3570_v57 = vcombine.high %v218_v46, %v234_v51 }
 0x106   : > { %v5137_v14 = vadd.f32 %v3918_v49, %v2705_v11  ;;  %4293 = vmatprep.subr.bf16.mxu1 %v4583_v13  ;;  %v3567_v49 = vcombine.low %v217_v44, %v233_v45  ;;  %3377 = vmatprep.mubr.bf16.mxu0 %v3568_v50 }
 0x107   : > { %3426 = vmatprep.mubr.bf16.mxu1 %v3570_v57 }
 0x108   : > { %4266 = vmatpush3.bf16.msra.mxu0 %v4584_v16 }
 0x109   : > { %4294 = vmatpush3.bf16.msra.mxu1 %v4585_v18  ;;  %4267 = vmatprep.subr.bf16.mxu0 %v4586_v20 }
 0x10a   : > { %4295 = vmatprep.subr.bf16.mxu1 %v4587_v23 }
 0x10c   : > { %4268 = vmatpush3.bf16.msra.mxu0 %v4588_v27 }
 0x10d   : > { %4296 = vmatpush3.bf16.msra.mxu1 %v4589_v30  ;;  %4269 = vmatprep.subr.bf16.mxu0 %v4590_v32 }
 0x10e   : > { %4297 = vmatprep.subr.bf16.mxu1 %v4591_v36 }
 0x110   : > { %4270 = vmatpush3.bf16.msra.mxu0 %v4592_v39 }
 0x111   : > { %4298 = vmatpush3.bf16.msra.mxu1 %v4593_v42 }
 0x113   : > { %v3935_v15 = vpop.f32.mrf.mxu0  ;;  %3378 = vmatmul.mubr.bf16.vlgmr.msra.gmra.mxu0 %v3567_v49 }
 0x114   : > { %v3963_v17 = vpop.f32.mrf.mxu1  ;;  %3427 = vmatmul.mubr.bf16.vlgmr.msra.gmra.mxu1 %v3569_v56  ;;  %3385 = vmatprep.mubr.bf16.mxu0 %v3600_v58 }
 0x115   : > { %v3936_v19 = vpop.f32.mrf.mxu0  ;;  %3434 = vmatprep.mubr.bf16.mxu1 %v3602_v62 }
 0x116   : > { %v3937_v21 = vadd.f32 %v3936_v19, %v3935_v15  ;;  %v3964_v22 = vpop.f32.mrf.mxu1 }
 0x117   : > { %v3965_v24 = vadd.f32 %v3964_v22, %v3963_v17  ;;  %v3938_v25 = vpop.f32.mrf.mxu0 }
 0x118   : > { %v2792_v28 = vadd.f32 %v3937_v21, %v5097_v26  ;;  %v3966_v29 = vpop.f32.mrf.mxu1 }
 0x119   : > { %v3939_v31 = vpop.f32.mrf.mxu0 }
 0x11a   : > { %v5147_v33 = vadd.f32 %v3965_v24, %v2792_v28  ;;  %v3940_v34 = vadd.f32 %v3939_v31, %v3938_v25  ;;  %v3967_v35 = vpop.f32.mrf.mxu1 }
 0x11b   : > { %v3968_v37 = vadd.f32 %v3967_v35, %v3966_v29  ;;  %v3941_v38 = vpop.f32.mrf.mxu0  ;;  %3386 = vmatmul.mubr.bf16.gmra.mxu0 %v3599_v7 }
 0x11c   : > { %v2795_v40 = vadd.f32 %v3940_v34, %v5103_v41  ;;  %v3969_v26 = vpop.f32.mrf.mxu1  ;;  %3435 = vmatmul.mubr.bf16.gmra.mxu1 %v3601_v9 }
 0x11d   : > { %v3942_v43 = vpop.f32.mrf.mxu0 }
 0x11e   : > { %v5162_v47 = vadd.f32 %v3968_v37, %v2795_v40  ;;  %v3943_v41 = vadd.f32 %v3942_v43, %v3941_v38  ;;  %v3970_v48 = vpop.f32.mrf.mxu1 }
 0x11f   : > { %v3944_v54 = vpop.f32.mrf.mxu0  ;;  %v3971_v55 = vadd.f32 %v3970_v48, %v3969_v26 }
 0x120   : > { %v3972_v61 = vpop.f32.mrf.mxu1  ;;  %v2800_v63 = vadd.f32 %v3943_v41, %v5129_v5 }
 0x121   : > { %v3945_v0 = vpop.f32.mrf.mxu0 }
 0x122   : > { %v3946_v1 = vadd.f32 %v3945_v0, %v3944_v54  ;;  %v3973_v2 = vpop.f32.mrf.mxu1  ;;  %v5180_v3 = vadd.f32 %v3971_v55, %v2800_v63 }
 0x123   : > { %v3974_v4 = vadd.f32 %v3973_v2, %v3972_v61 }
 0x124   : > { %v2803_v6 = vadd.f32 %v3946_v1, %v5137_v14 }
 0x126   : > { %v5183_v8 = vadd.f32 %v3974_v4, %v2803_v6 }
 0x133   : > { %v5185_v5 = vpop.f32.mrf.mxu0 }
 0x134   : > { %v5191_v12 = vpop.f32.mrf.mxu1 }
 0x135   : > { %v5187_v10 = vpop.f32.mrf.mxu0 }
 0x136   : > { %v5195_v15 = vpop.f32.mrf.mxu1 }
 0x137   : > { %v5189_v11 = vpop.f32.mrf.mxu0 }
 0x138   : > { %v5199_v14 = vpop.f32.mrf.mxu1 }
 0x139   : > { %v5193_v13 = vpop.f32.mrf.mxu0 }
 0x13a   : > { %v5203_v18 = vpop.f32.mrf.mxu1 }
 0x13b   : > { %v5197_v16 = vpop.f32.mrf.mxu0 }
 0x13c   : > { %v5207_v20 = vpop.f32.mrf.mxu1 }
 0x13d   : > { %v5201_v17 = vpop.f32.mrf.mxu0 }
 0x13e   : > { %v5211_v22 = vpop.f32.mrf.mxu1 }
 0x13f   : > { %v5205_v19 = vpop.f32.mrf.mxu0 }
 0x140   : > { %v5213_v24 = vpop.f32.mrf.mxu1 }
 0x141   : > { %v5209_v21 = vpop.f32.mrf.mxu0 }
 0x142   : > { %v5215_v27 = vpop.f32.mrf.mxu1 }
 0x153   : > { %v4047_v23 = vpop.f32.mrf.mxu0 }
 0x154   : > { %v4075_v29 = vpop.f32.mrf.mxu1 }
 0x155   : > { %v4048_v25 = vpop.f32.mrf.mxu0 }
 0x156   : > { %v4076_v31 = vpop.f32.mrf.mxu1 }
 0x157   : > { %v4050_v28 = vpop.f32.mrf.mxu0 }
 0x158   : > { %v5219_v34 = vpop.f32.mrf.mxu1 }
 0x159   : > { %v4051_v30 = vpop.f32.mrf.mxu0 }
 0x15a   : > { %v5223_v36 = vpop.f32.mrf.mxu1 }
 0x15b   : > { %v5217_v32 = vpop.f32.mrf.mxu0 }
 0x15c   : > { %v5225_v37 = vpop.f32.mrf.mxu1 }
 0x15d   : > { %v5221_v35 = vpop.f32.mrf.mxu0 }
 0x15e   : > { %v5229_v39 = vpop.f32.mrf.mxu1 }
 0x15f   : > { %v5227_v38 = vpop.f32.mrf.mxu0 }
 0x160   : > { %v5233_v42 = vpop.f32.mrf.mxu1 }
 0x161   : > { %v5231_v40 = vpop.f32.mrf.mxu0 }
 0x162   : > { %v5235_v44 = vpop.f32.mrf.mxu1 }
 0x173   : > { %v4103_v26 = vpop.f32.mrf.mxu0 }
 0x174   : > { %v5237_v45 = vpop.f32.mrf.mxu1 }
 0x175   : > { %v4104_v43 = vpop.f32.mrf.mxu0 }
 0x176   : > { %v4132_v41 = vpop.f32.mrf.mxu1 }
 0x177   : > { %v5239_v46 = vpop.f32.mrf.mxu0 }
 0x178   : > { %v5241_v49 = vpop.f32.mrf.mxu1 }
 0x179   : > { %v4107_v48 = vpop.f32.mrf.mxu0 }
 0x17a   : > { %v5245_v51 = vpop.f32.mrf.mxu1 }
 0x17b   : > { %v5243_v50 = vpop.f32.mrf.mxu0 }
 0x17c   : > { %v5249_v53 = vpop.f32.mrf.mxu1 }
 0x17d   : > { %v5247_v52 = vpop.f32.mrf.mxu0 }
 0x17e   : > { %v5253_v55 = vpop.f32.mrf.mxu1 }
 0x17f   : > { %v5251_v54 = vpop.f32.mrf.mxu0  ;;  %5384 = vst [vmem:[#allocation3_spill] sm:$0xff] %v5253_v55 }
 0x180   : > { %5383 = vst [vmem:[#allocation2_spill] sm:$0xff] %v5251_v54  ;;  %v5257_v57 = vpop.f32.mrf.mxu1 }
 0x181   : > { %v5255_v56 = vpop.f32.mrf.mxu0  ;;  %5386 = vst [vmem:[#allocation5_spill] sm:$0xff] %v5257_v57 }
 0x182   : > { %5385 = vst [vmem:[#allocation4_spill] sm:$0xff] %v5255_v56  ;;  %v5259_v59 = vpop.f32.mrf.mxu1 }
 0x183   : > { %5387 = vst [vmem:[#allocation6_spill] sm:$0xff] %v5259_v59 }
 0x193   : > { %v4159_v58 = vpop.f32.mrf.mxu0 }
 0x194   : > { %v5261_v61 = vpop.f32.mrf.mxu1 }
 0x195   : > { %v4160_v60 = vpop.f32.mrf.mxu0 }
 0x196   : > { %v5265_v63 = vpop.f32.mrf.mxu1 }
 0x197   : > { %v5263_v62 = vpop.f32.mrf.mxu0 }
 0x198   : > { %v5269_v1 = vpop.f32.mrf.mxu1 }
 0x199   : > { %v5267_v0 = vpop.f32.mrf.mxu0  ;;  %5388 = vst [vmem:[#allocation7_spill] sm:$0xff] %v5269_v1  ;;  %v3993_v1 = vadd.f32 %v5187_v10, %v5185_v5 }
 0x19a   : > { %v5273_v4 = vpop.f32.mrf.mxu1 }
 0x19b   : > { %v5271_v2 = vpop.f32.mrf.mxu0  ;;  %5390 = vst [vmem:[#allocation9_spill] sm:$0xff] %v5273_v4 }
 0x19c   : > { %5389 = vst [vmem:[#allocation8_spill] sm:$0xff] %v5271_v2  ;;  %v5275_v6 = vpop.f32.mrf.mxu1 }
 0x19d   : > { %5391 = vst [vmem:[#allocation10_spill] sm:$0xff] %v5275_v6  ;;  %v5277_v7 = vpop.f32.mrf.mxu0  ;;  %v2890_v6 = vadd.f32 %v3993_v1, %v5147_v33  ;;  %v4024_v33 = vadd.f32 %v5203_v18, %v5199_v14 }
 0x19e   : > { %5392 = vst [vmem:[#allocation11_spill] sm:$0xff] %v5277_v7  ;;  %v5279_v9 = vpop.f32.mrf.mxu1 }
 0x19f   : > { %5393 = vst [vmem:[#allocation12_spill] sm:$0xff] %v5279_v9  ;;  %v5281_v59 = vpop.f32.mrf.mxu0  ;;  %v4021_v9 = vadd.f32 %v5195_v15, %v5191_v12  ;;  %v4052_v12 = vadd.f32 %v4051_v30, %v4050_v28 }
 0x1a0   : > { %5394 = vst [vmem:[#allocation13_spill] sm:$0xff] %v5281_v59  ;;  %v5283_v57 = vpop.f32.mrf.mxu1  ;;  %v3996_v59 = vadd.f32 %v5193_v13, %v5189_v11  ;;  %v4027_v13 = vadd.f32 %v5211_v22, %v5207_v20  ;;  %v4133_v22 = vadd.f32 %v4132_v41, %v5237_v45 }
 0x1a1   : > { %5395 = vst [vmem:[#allocation14_spill] sm:$0xff] %v5283_v57  ;;  %v5285_v56 = vpop.f32.mrf.mxu0  ;;  %v4049_v57 = vadd.f32 %v4048_v25, %v4047_v23  ;;  %v2939_v10 = vadd.f32 %v4021_v9, %v2890_v6  ;;  %v4105_v25 = vadd.f32 %v4104_v43, %v4103_v26  ;;  %v4083_v26 = vadd.f32 %v5229_v39, %v5225_v37 }
 0x1a2   : > { %5396 = vst [vmem:[#allocation15_spill] sm:$0xff] %v5285_v56  ;;  %v5289_v55 = vpop.f32.mrf.mxu1  ;;  %v3999_v56 = vadd.f32 %v5201_v17, %v5197_v16  ;;  %v4002_v16 = vadd.f32 %v5209_v21, %v5205_v19  ;;  %v4080_v19 = vadd.f32 %v5223_v36, %v5219_v34  ;;  %v4136_v37 = vadd.f32 %v5245_v51, %v5241_v49 }
 0x1a3   : > { %5397 = vst [vmem:[#allocation16_spill] sm:$0xff] %v5289_v55  ;;  %v2893_v55 = vadd.f32 %v3996_v59, %v5162_v47  ;;  %v2988_v1 = vadd.f32 %v4049_v57, %v2939_v10  ;;  %v4055_v47 = vadd.f32 %v5221_v35, %v5217_v32  ;;  %v5401_v59 = vld [vmem:[#allocation4_spill] sm:$0xff] }
 0x1a4   : > { %v2898_v11 = vadd.f32 %v3999_v56, %v5180_v3  ;;  %v2901_v30 = vadd.f32 %v4002_v16, %v5183_v8  ;;  %v4030_v3 = vadd.f32 %v5215_v27, %v5213_v24  ;;  %v4058_v8 = vadd.f32 %v5231_v40, %v5227_v38  ;;  %v5402_v49 = vld [vmem:[#allocation8_spill] sm:$0xff] }
 0x1a5   : > { %v2942_v23 = vadd.f32 %v4024_v33, %v2893_v55  ;;  %v4161_v55 = vadd.f32 %v4160_v60, %v4159_v58  ;;  %v4111_v27 = vadd.f32 %v5247_v52, %v5243_v50  ;;  %v4189_v38 = vadd.f32 %v5265_v63, %v5261_v61  ;;  %v5399_v52 = vld [vmem:[#allocation3_spill] sm:$0xff]  ;;  %v5400_v58 = vld [vmem:[#allocation2_spill] sm:$0xff] }
 0x1a6   : > { %v2947_v28 = vadd.f32 %v4027_v13, %v2898_v11  ;;  %v2950_v24 = vadd.f32 %v4030_v3, %v2901_v30  ;;  %v4164_v40 = vadd.f32 %v5267_v0, %v5263_v62  ;;  %v4139_v57 = vadd.f32 %v5399_v52, %v5249_v53  ;;  %v5403_v51 = vld [vmem:[#allocation11_spill] sm:$0xff]  ;;  %v5404_v62 = vld [vmem:[#allocation5_spill] sm:$0xff]  ;;  %v5405_v0 = vld [vmem:[#allocation6_spill] sm:$0xff] }
 0x1a7   : > { %v2991_v18 = vadd.f32 %v4052_v12, %v2942_v23  ;;  %v4114_v60 = vadd.f32 %v5401_v59, %v5400_v58  ;;  %v4167_v10 = vadd.f32 %v5403_v51, %v5402_v49  ;;  %v4142_v12 = vadd.f32 %v5405_v0, %v5404_v62  ;;  %v5406_v53 = vld [vmem:[#allocation7_spill] sm:$0xff]  ;;  %v5407_v13 = vld [vmem:[#allocation9_spill] sm:$0xff] }
 0x1a8   : > { %v2996_v35 = vadd.f32 %v4055_v47, %v2947_v28  ;;  %v4192_v16 = vadd.f32 %v5407_v13, %v5406_v53  ;;  %v5410_v28 = vld [vmem:[#allocation12_spill] sm:$0xff]  ;;  %v5411_v3 = vld [vmem:[#allocation13_spill] sm:$0xff] }
 0x1a9   : > { %v3040_v43 = vadd.f32 %v4080_v19, %v2991_v18  ;;  %v5409_v18 = vld [vmem:[#allocation10_spill] sm:$0xff]  ;;  %v5412_v19 = vld [vmem:[#allocation15_spill] sm:$0xff] }
 0x1aa   : > { %v3045_v41 = vadd.f32 %v4083_v26, %v2996_v35  ;;  %v4195_v30 = vadd.f32 %v5410_v28, %v5409_v18 }
 0x1ac   : > { %v3094_v50 = vadd.f32 %v4111_v27, %v3045_v41  ;;  %v5414_v41 = vld [vmem:[#allocation16_spill] sm:$0xff] }
 0x1ae   : > { %v3143_v63 = vadd.f32 %v4139_v57, %v3094_v50 }
 0x1b3   : > { %v4215_v54 = vpop.f32.mrf.mxu0 }
 0x1b4   : > { %v5291_v2 = vpop.f32.mrf.mxu1 }
 0x1b5   : > { %5398 = vst [vmem:[#allocation17_spill] sm:$0xff] %v5291_v2  ;;  %v4216_v4 = vpop.f32.mrf.mxu0  ;;  %v4077_v2 = vadd.f32 %v4076_v31, %v4075_v29  ;;  %v4108_v31 = vadd.f32 %v4107_v48, %v5239_v46  ;;  %v2999_v46 = vadd.f32 %v4058_v8, %v2950_v24  ;;  %v4086_v48 = vadd.f32 %v5235_v44, %v5233_v42 }
 0x1b6   : > { %v5298_v7 = vpop.f32.mrf.mxu1  ;;  %v4217_v42 = vadd.f32 %v4216_v4, %v4215_v54 }
 0x1b7   : > { %v5302_v5 = vpop.f32.mrf.mxu0  ;;  %v3037_v14 = vadd.f32 %v4077_v2, %v2988_v1  ;;  %v3089_v56 = vadd.f32 %v4108_v31, %v3040_v43  ;;  %v3048_v9 = vadd.f32 %v4086_v48, %v2999_v46 }
 0x1b8   : > { %v5307_v15 = vpop.f32.mrf.mxu1 }
 0x1b9   : > { %v4219_v17 = vpop.f32.mrf.mxu0  ;;  %v3086_v21 = vadd.f32 %v4105_v25, %v3037_v14  ;;  %v3138_v6 = vadd.f32 %v4136_v37, %v3089_v56  ;;  %v3097_v1 = vadd.f32 %v4114_v60, %v3048_v9  ;;  %v3192_v14 = vadd.f32 %v4167_v10, %v3143_v63  ;;  %v5413_v56 = vld [vmem:[#allocation14_spill] sm:$0xff] }
 0x1ba   : > { %v5316_v29 = vpop.f32.mrf.mxu1  ;;  %v4220_v4 = vadd.f32 %v4219_v17, %v5302_v5  ;;  %v4198_v46 = vadd.f32 %v5414_v41, %v5413_v56 }
 0x1bb   : > { %v4221_v20 = vpop.f32.mrf.mxu0  ;;  %v3135_v36 = vadd.f32 %v4133_v22, %v3086_v21  ;;  %v3187_v61 = vadd.f32 %v4164_v40, %v3138_v6  ;;  %v4170_v21 = vadd.f32 %v5412_v19, %v5411_v3  ;;  %v3146_v26 = vadd.f32 %v4142_v12, %v3097_v1 }
 0x1bc   : > { %v4249_v32 = vpop.f32.mrf.mxu1  ;;  %v5408_v25 = vld [vmem:[#allocation17_spill] sm:$0xff]  ;;  %v3241_v5 = vadd.f32 %v4195_v30, %v3192_v14  ;;  %v4248_v48 = vadd.f32 %v5316_v29, %v5307_v15 }
 0x1bd   : > { %v4222_v34 = vpop.f32.mrf.mxu0  ;;  %v3184_v39 = vadd.f32 %v4161_v55, %v3135_v36  ;;  %v4245_v54 = vadd.f32 %v5298_v7, %v5408_v25  ;;  %v3236_v31 = vadd.f32 %v4192_v16, %v3187_v61  ;;  %v3195_v17 = vadd.f32 %v4170_v21, %v3146_v26 }
 0x1be   : > { %v4250_v45 = vpop.f32.mrf.mxu1  ;;  %v4223_v8 = vadd.f32 %v4222_v34, %v4221_v20 }
 0x1bf   : > { %v4224_v2 = vpop.f32.mrf.mxu0  ;;  %v3233_v33 = vadd.f32 %v4189_v38, %v3184_v39  ;;  %v3285_v24 = vadd.f32 %v4220_v4, %v3236_v31  ;;  %v4251_v20 = vadd.f32 %v4250_v45, %v4249_v32  ;;  %v3244_v15 = vadd.f32 %v4198_v46, %v3195_v17 }
 0x1c0   : > { %v4252_v44 = vpop.f32.mrf.mxu1  ;;  %v3290_v40 = vadd.f32 %v4223_v8, %v3241_v5 }
 0x1c1   : > { %v4225_v11 = vpop.f32.mrf.mxu0  ;;  %v3282_v23 = vadd.f32 %v4217_v42, %v3233_v33  ;;  %v3334_v50 = vadd.f32 %v4248_v48, %v3285_v24 }
 0x1c2   : > { %v4253_v47 = vpop.f32.mrf.mxu1  ;;  %v4226_v52 = vadd.f32 %v4225_v11, %v4224_v2  ;;  %v3339_v32 = vadd.f32 %v4251_v20, %v3290_v40 }
 0x1c3   : > { %v3331_v55 = vadd.f32 %v4245_v54, %v3282_v23  ;;  %v4254_v49 = vadd.f32 %v4253_v47, %v4252_v44 }
 0x1c4   : > { %v3293_v9 = vadd.f32 %v4226_v52, %v3244_v15 }
 0x1c6   : > { %v3342_v0 = vadd.f32 %v4254_v49, %v3293_v9 }
 0x1d3   : > { %v4271_v22 = vpop.f32.mrf.mxu0 }
 0x1d4   : > { %v4299_v35 = vpop.f32.mrf.mxu1 }
 0x1d5   : > { %v4272_v43 = vpop.f32.mrf.mxu0 }
 0x1d6   : > { %v4273_v27 = vadd.f32 %v4272_v43, %v4271_v22  ;;  %v4300_v7 = vpop.f32.mrf.mxu1 }
 0x1d7   : > { %v4274_v36 = vpop.f32.mrf.mxu0  ;;  %v4301_v39 = vadd.f32 %v4300_v7, %v4299_v35 }
 0x1d8   : > { %v3380_v37 = vadd.f32 %v4273_v27, %v3331_v55  ;;  %v4302_v38 = vpop.f32.mrf.mxu1 }
 0x1d9   : > { %v4275_v34 = vpop.f32.mrf.mxu0 }
 0x1da   : > { %v3429_v57 = vadd.f32 %v4301_v39, %v3380_v37  ;;  %v4276_v58 = vadd.f32 %v4275_v34, %v4274_v36  ;;  %v4303_v59 = vpop.f32.mrf.mxu1 }
 0x1db   : > { %v4277_v60 = vpop.f32.mrf.mxu0  ;;  %v4304_v6 = vadd.f32 %v4303_v59, %v4302_v38 }
 0x1dc   : > { %3443 = vst [vmem:[%s5364_s25] sm:$0xff] %v3429_v57  ;;  %v3383_v29 = vadd.f32 %v4276_v58, %v3334_v50  ;;  %v4305_v42 = vpop.f32.mrf.mxu1 }
 0x1dd   : > { %v4278_v45 = vpop.f32.mrf.mxu0 }
 0x1de   : > { %v3432_v51 = vadd.f32 %v4304_v6, %v3383_v29  ;;  %v4279_v10 = vadd.f32 %v4278_v45, %v4277_v60  ;;  %v4306_v33 = vpop.f32.mrf.mxu1 }
 0x1df   : > { %v4280_v2 = vpop.f32.mrf.mxu0  ;;  %v4307_v63 = vadd.f32 %v4306_v33, %v4305_v42 }
 0x1e0   : > { %3444 = vst [vmem:[%s5364_s25 + $0x8] sm:$0xff] %v3432_v51  ;;  %v3388_v61 = vadd.f32 %v4279_v10, %v3339_v32  ;;  %v4308_v1 = vpop.f32.mrf.mxu1 }
 0x1e1   : > { %v4281_v62 = vpop.f32.mrf.mxu0 }
 0x1e2   : > { %v3437_v12 = vadd.f32 %v4307_v63, %v3388_v61  ;;  %v4282_v11 = vadd.f32 %v4281_v62, %v4280_v2  ;;  %v4309_v53 = vpop.f32.mrf.mxu1 }
 0x1e3   : > { %v4310_v16 = vadd.f32 %v4309_v53, %v4308_v1 }
 0x1e4   : > { %3445 = vst [vmem:[%s5364_s25 + $0x10] sm:$0xff] %v3437_v12  ;;  %v3391_v13 = vadd.f32 %v4282_v11, %v3342_v0 }
 0x1e6   : > { %v3440_v23 = vadd.f32 %v4310_v16, %v3391_v13 }
 0x1e8   : > { %3446 = vst [vmem:[%s5364_s25 + $0x18] sm:$0xff] %v3440_v23 }
 0x1e9 PF: > { %s13_s14 = sadd.s32 1, %s4616_s14   ;;  %s5415_s12 = smov %s4612_s13 }
 0x1ea   : > { %p10_p5 = scmp.ge.s32.totalorder %s13_s14, 4   ;;  %s5416_s13 = smov %s5418_s15 }
 0x1ec   :  { %12 = sbr.rel (!%p10_p5) target bundleno = 2 (0x2), region = 62 }

</bundles_post_ra>
